<compile_context>
chip_gen: v6e
topology: v6e:2x2x1
jax: 0.10.0
libtpu: 0.0.40
codegen_flags: <defaults>
</compile_context>

<pallas_src>
import functools

import jax
import jax.numpy as jnp
from jax import lax
from jax.experimental import pallas as pl
from jax.experimental.pallas import tpu as pltpu


# ----------------------------------------------------------------------------
# Fused Pallas kernel: all LSTM layers + MLP head, single invocation (no grid)
# ----------------------------------------------------------------------------
def _fused_lstm_kernel(*refs, hidden_size, num_layers):
    """Ref layout (positional):
      refs[0]                      x_flat   (T*B, D)     time-major flattened input
      refs[1 : 1+3L]               per layer: w_ih (D_l,4H), w_hh (H,4H), b (1,4H)
      refs[1+3L : 1+3L+4]          head: w1 (H,128), b1 (1,128), w2 (128,O), b2 (1,O)
      refs[1+3L+4]                 out      (B, O)
      refs[1+3L+5]                 seq_scr  (T*B, H)   VMEM inter-layer hidden seq
      refs[1+3L+6]                 gates_scr(T*B, 4H)  VMEM pre-projected gates
    """
    H, L = hidden_size, num_layers
    n_in = 1 + 3 * L + 4

    x_ref = refs[0]
    layer_refs = refs[1:1 + 3 * L]
    w1_ref, b1_ref, w2_ref, b2_ref = refs[1 + 3 * L:n_in]
    out_ref = refs[n_in]
    seq_scr = refs[n_in + 1]
    gates_scr = refs[n_in + 2]

    B = out_ref.shape[0]
    T = seq_scr.shape[0] // B

    h_last = jnp.zeros((B, H), jnp.float32)
    for layer in range(L):
        w_ih = layer_refs[3 * layer][...]       # (D_l, 4H)
        w_hh = layer_refs[3 * layer + 1][...]   # (H, 4H)
        b = layer_refs[3 * layer + 2][...]      # (1, 4H), b_ih + b_hh fused

        # Hoisted input projection for the whole sequence: one big MXU matmul,
        # bias folded in here so the time loop only adds the h @ W_hh term.
        layer_in = x_ref[...] if layer == 0 else seq_scr[...]
        gates_scr[...] = (
            jnp.dot(layer_in, w_ih, preferred_element_type=jnp.float32) + b)

        # Only layers feeding a next layer need the full hidden sequence; the
        # last layer only needs its final hidden state (feeds the head).
        write_seq = layer < L - 1

        def step(t, carry, *, w_hh=w_hh, write_seq=write_seq):
            h_prev, c_prev = carry
            row = pl.multiple_of(t * B, B)      # sublane-aligned (B multiple of 8)
            g = gates_scr[pl.ds(row, B), :] + jnp.dot(
                h_prev, w_hh, preferred_element_type=jnp.float32)   # (B, 4H)
            i_g = jax.nn.sigmoid(g[:, 0 * H:1 * H])
            f_g = jax.nn.sigmoid(g[:, 1 * H:2 * H])
            g_g = jnp.tanh(g[:, 2 * H:3 * H])
            o_g = jax.nn.sigmoid(g[:, 3 * H:4 * H])
            c_new = f_g * c_prev + i_g * g_g
            h_new = o_g * jnp.tanh(c_new)
            if write_seq:
                seq_scr[pl.ds(row, B), :] = h_new
            return h_new, c_new

        h0 = jnp.zeros((B, H), jnp.float32)
        c0 = jnp.zeros((B, H), jnp.float32)
        h_last, _ = lax.fori_loop(0, T, step, (h0, c0), unroll=True)

    # Head fused in-kernel: relu(hn) -> fc_1 -> relu -> fc
    z = jnp.maximum(h_last, 0.0)
    z = jnp.maximum(
        jnp.dot(z, w1_ref[...], preferred_element_type=jnp.float32) + b1_ref[...],
        0.0)
    out = jnp.dot(z, w2_ref[...], preferred_element_type=jnp.float32) + b2_ref[...]
    out_ref[...] = out.astype(out_ref.dtype)


# ----------------------------------------------------------------------------
# Wrapper
# ----------------------------------------------------------------------------
def lstm_model_forward(x_btd, params, hidden_size):
    """Full forward matching the PyTorch module.  x_btd: (B, T, input_size)."""
    B, T, D = x_btd.shape
    H = hidden_size
    L = len(params["lstm_layers"])
    O = params["fc2_w_t"].shape[1]

    # Time-major flattened rows (row index = t*B + b); done in XLA, outside kernel.
    x_flat = jnp.transpose(x_btd, (1, 0, 2)).reshape(T * B, D)

    args = [x_flat]
    for lp in params["lstm_layers"]:
        args += [lp["w_ih_t"], lp["w_hh_t"], lp["b"]]
    args += [params["fc1_w_t"], params["fc1_b"],
             params["fc2_w_t"], params["fc2_b"]]

    kernel = functools.partial(_fused_lstm_kernel, hidden_size=H, num_layers=L)

    return pl.pallas_call(
        kernel,
        out_shape=jax.ShapeDtypeStruct((B, O), jnp.float32),
        scratch_shapes=[
            pltpu.VMEM((T * B, H), jnp.float32),       # inter-layer hidden sequence
            pltpu.VMEM((T * B, 4 * H), jnp.float32),   # hoisted input-gate projection
        ],
    )(*args)


# ----------------------------------------------------------------------------
# Deterministic parameter init (PyTorch-shaped weights, stored transposed)
# ----------------------------------------------------------------------------
def init_params(key, input_size, hidden_size, num_layers, output_size):
    H = hidden_size
    params = {"lstm_layers": []}
    for layer in range(num_layers):
        d_in = input_size if layer == 0 else H
        key, k1, k2, k3, k4 = jax.random.split(key, 5)
        scale = 1.0 / jnp.sqrt(H)
        # PyTorch shapes: weight_ih (4H, d_in), weight_hh (4H, H); store transposed.
        w_ih_t = jax.random.uniform(k1, (d_in, 4 * H), jnp.float32, -scale, scale)
        w_hh_t = jax.random.uniform(k2, (H, 4 * H), jnp.float32, -scale, scale)
        b_ih = jax.random.uniform(k3, (4 * H,), jnp.float32, -scale, scale)
        b_hh = jax.random.uniform(k4, (4 * H,), jnp.float32, -scale, scale)
        params["lstm_layers"].append(
            {"w_ih_t": w_ih_t, "w_hh_t": w_hh_t,
             "b": (b_ih + b_hh).reshape(1, 4 * H)})
    key, k1, k2, k3, k4 = jax.random.split(key, 5)
    s1 = 1.0 / jnp.sqrt(H)
    params["fc1_w_t"] = jax.random.uniform(k1, (H, 128), jnp.float32, -s1, s1)
    params["fc1_b"] = jax.random.uniform(k2, (1, 128), jnp.float32, -s1, s1)
    s2 = 1.0 / jnp.sqrt(128.0)
    params["fc2_w_t"] = jax.random.uniform(k3, (128, output_size), jnp.float32, -s2, s2)
    params["fc2_b"] = jax.random.uniform(k4, (1, output_size), jnp.float32, -s2, s2)
    return params


# ----------------------------------------------------------------------------
# Pure-JAX reference (mirrors torch.nn.LSTM + head) for correctness check
# ----------------------------------------------------------------------------
def reference_forward(x_btd, params, hidden_size):
    H = hidden_size
    x = jnp.transpose(x_btd, (1, 0, 2))  # (T, B, D)
    for lp in params["lstm_layers"]:
        T, B, _ = x.shape
        h = jnp.zeros((B, H), jnp.float32)
        c = jnp.zeros((B, H), jnp.float32)
        outs = []
        for t in range(T):
            g = x[t] @ lp["w_ih_t"] + h @ lp["w_hh_t"] + lp["b"]
            i = jax.nn.sigmoid(g[:, 0 * H:1 * H])
            f = jax.nn.sigmoid(g[:, 1 * H:2 * H])
            gg = jnp.tanh(g[:, 2 * H:3 * H])
            o = jax.nn.sigmoid(g[:, 3 * H:4 * H])
            c = f * c + i * gg
            h = o * jnp.tanh(c)
            outs.append(h)
        x = jnp.stack(outs, axis=0)
    hn = jnp.maximum(x[-1], 0.0)
    z = jnp.maximum(hn @ params["fc1_w_t"] + params["fc1_b"], 0.0)
    return z @ params["fc2_w_t"] + params["fc2_b"]


if __name__ == "__main__":
    # Small, forward-consistent shapes; B chosen as a multiple of 8 (sublanes),
    # 4H = 128 so the fused gate dimension is exactly one lane tile.
    B, T = 8, 8
    input_size, hidden_size, num_layers, output_size = 8, 32, 2, 4

    key = jax.random.PRNGKey(0)
    key, pkey, xkey = jax.random.split(key, 3)
    params = init_params(pkey, input_size, hidden_size, num_layers, output_size)
    x = jax.random.normal(xkey, (B, T, input_size), jnp.float32)

    out = lstm_model_forward(x, params, hidden_size)
    out = jax.block_until_ready(out)

    ref = reference_forward(x, params, hidden_size)
    assert out.shape == (B, output_size), out.shape
    assert bool(jnp.all(jnp.isfinite(out)))
    assert bool(jnp.allclose(out, ref, rtol=1e-3, atol=1e-3)), (out, ref)

    print("KERNEL_OK")
</pallas_src>

<mosaic_0001>
module attributes {stable_mosaic.version = 11 : i64} {
  func.func @_fused_lstm_kernel(%arg0: memref<64x8xf32, #tpu.memory_space<vmem>>, %arg1: memref<8x128xf32, #tpu.memory_space<vmem>>, %arg2: memref<32x128xf32, #tpu.memory_space<vmem>>, %arg3: memref<1x128xf32, #tpu.memory_space<vmem>>, %arg4: memref<32x128xf32, #tpu.memory_space<vmem>>, %arg5: memref<32x128xf32, #tpu.memory_space<vmem>>, %arg6: memref<1x128xf32, #tpu.memory_space<vmem>>, %arg7: memref<32x128xf32, #tpu.memory_space<vmem>>, %arg8: memref<1x128xf32, #tpu.memory_space<vmem>>, %arg9: memref<128x4xf32, #tpu.memory_space<vmem>>, %arg10: memref<1x4xf32, #tpu.memory_space<vmem>>, %arg11: memref<8x4xf32, #tpu.memory_space<vmem>>, %arg12: memref<64x32xf32, #tpu.memory_space<vmem>>, %arg13: memref<64x128xf32, #tpu.memory_space<vmem>>) attributes {dimension_semantics = [], scalar_prefetch = 0 : i64, scratch_operands = 2 : i64, tpu.core_type = #tpu.core_type<tc>} {
    %c0 = arith.constant 0 : index
    %c0_0 = arith.constant 0 : index
    %0 = vector.load %arg1[%c0, %c0_0] : memref<8x128xf32, #tpu.memory_space<vmem>>, vector<8x128xf32>
    %c0_1 = arith.constant 0 : index
    %c0_2 = arith.constant 0 : index
    %1 = vector.load %arg2[%c0_1, %c0_2] : memref<32x128xf32, #tpu.memory_space<vmem>>, vector<32x128xf32>
    %c0_3 = arith.constant 0 : index
    %c0_4 = arith.constant 0 : index
    %2 = vector.load %arg3[%c0_3, %c0_4] : memref<1x128xf32, #tpu.memory_space<vmem>>, vector<1x128xf32>
    %c0_5 = arith.constant 0 : index
    %c0_6 = arith.constant 0 : index
    %3 = vector.load %arg0[%c0_5, %c0_6] : memref<64x8xf32, #tpu.memory_space<vmem>>, vector<64x8xf32>
    %cst = arith.constant dense<0.000000e+00> : vector<64x128xf32>
    %4 = tpu.matmul %3, %0, %cst {dimension_numbers = #tpu.dot_dimension_numbers<[1], [0], [0], [1], [0, 0, 1, 1], [], []>} : vector<64x8xf32>, vector<8x128xf32>, vector<64x128xf32> -> vector<64x128xf32>
    %5 = vector.broadcast %2 : vector<1x128xf32> to vector<64x128xf32>
    %6 = arith.addf %4, %5 : vector<64x128xf32>
    %c0_7 = arith.constant 0 : index
    %c0_8 = arith.constant 0 : index
    %7 = vector.load %arg13[%c0_7, %c0_8] : memref<64x128xf32, #tpu.memory_space<vmem>>, vector<64x128xf32>
    tpu.vector_store %arg13[%c0_7, %c0_8], %6 {strides = array<i32>} : memref<64x128xf32, #tpu.memory_space<vmem>>, vector<64x128xf32>,
    %cst_9 = arith.constant 0.000000e+00 : f32
    %8 = vector.broadcast %cst_9 : f32 to vector<8x32xf32>
    %cst_10 = arith.constant 0.000000e+00 : f32
    %9 = vector.broadcast %cst_10 : f32 to vector<8x32xf32>
    %c0_i32 = arith.constant 0 : i32
    %c8_i32 = arith.constant 8 : i32
    %10 = arith.muli %c0_i32, %c8_i32 : i32
    %11 = tpu.assume_multiple %10, 8 : i32
    %12 = arith.index_cast %11 : i32 to index
    %c0_11 = arith.constant 0 : index
    %13 = vector.load %arg13[%12, %c0_11] : memref<64x128xf32, #tpu.memory_space<vmem>>, vector<8x128xf32>
    %cst_12 = arith.constant dense<0.000000e+00> : vector<8x128xf32>
    %14 = tpu.matmul %8, %1, %cst_12 {dimension_numbers = #tpu.dot_dimension_numbers<[1], [0], [0], [1], [0, 0, 1, 1], [], []>} : vector<8x32xf32>, vector<32x128xf32>, vector<8x128xf32> -> vector<8x128xf32>
    %15 = arith.addf %13, %14 : vector<8x128xf32>
    %16 = vector.extract_strided_slice %15 {offsets = [0, 0], sizes = [8, 32], strides = [1, 1]} : vector<8x128xf32> to vector<8x32xf32>
    %17 = arith.negf %16 : vector<8x32xf32>
    %18 = math.exp %17 : vector<8x32xf32>
    %cst_13 = arith.constant 1.000000e+00 : f32
    %19 = vector.broadcast %cst_13 : f32 to vector<8x32xf32>
    %20 = arith.addf %19, %18 : vector<8x32xf32>
    %21 = arith.divf %19, %20 : vector<8x32xf32>
    %22 = vector.extract_strided_slice %15 {offsets = [0, 32], sizes = [8, 32], strides = [1, 1]} : vector<8x128xf32> to vector<8x32xf32>
    %23 = arith.negf %22 : vector<8x32xf32>
    %24 = math.exp %23 : vector<8x32xf32>
    %cst_14 = arith.constant 1.000000e+00 : f32
    %25 = vector.broadcast %cst_14 : f32 to vector<8x32xf32>
    %26 = arith.addf %25, %24 : vector<8x32xf32>
    %27 = arith.divf %25, %26 : vector<8x32xf32>
    %28 = vector.extract_strided_slice %15 {offsets = [0, 64], sizes = [8, 32], strides = [1, 1]} : vector<8x128xf32> to vector<8x32xf32>
    %29 = math.tanh %28 : vector<8x32xf32>
    %30 = vector.extract_strided_slice %15 {offsets = [0, 96], sizes = [8, 32], strides = [1, 1]} : vector<8x128xf32> to vector<8x32xf32>
    %31 = arith.negf %30 : vector<8x32xf32>
    %32 = math.exp %31 : vector<8x32xf32>
    %cst_15 = arith.constant 1.000000e+00 : f32
    %33 = vector.broadcast %cst_15 : f32 to vector<8x32xf32>
    %34 = arith.addf %33, %32 : vector<8x32xf32>
    %35 = arith.divf %33, %34 : vector<8x32xf32>
    %36 = arith.mulf %27, %9 : vector<8x32xf32>
    %37 = arith.mulf %21, %29 : vector<8x32xf32>
    %38 = arith.addf %36, %37 : vector<8x32xf32>
    %39 = math.tanh %38 : vector<8x32xf32>
    %40 = arith.mulf %35, %39 : vector<8x32xf32>
    %41 = arith.index_cast %11 : i32 to index
    %c0_16 = arith.constant 0 : index
    %42 = vector.load %arg12[%41, %c0_16] : memref<64x32xf32, #tpu.memory_space<vmem>>, vector<8x32xf32>
    tpu.vector_store %arg12[%41, %c0_16], %40 {strides = array<i32>} : memref<64x32xf32, #tpu.memory_space<vmem>>, vector<8x32xf32>,
    %c1_i32 = arith.constant 1 : i32
    %c8_i32_17 = arith.constant 8 : i32
    %43 = arith.muli %c1_i32, %c8_i32_17 : i32
    %44 = tpu.assume_multiple %43, 8 : i32
    %45 = arith.index_cast %44 : i32 to index
    %c0_18 = arith.constant 0 : index
    %46 = vector.load %arg13[%45, %c0_18] : memref<64x128xf32, #tpu.memory_space<vmem>>, vector<8x128xf32>
    %cst_19 = arith.constant dense<0.000000e+00> : vector<8x128xf32>
    %47 = tpu.matmul %40, %1, %cst_19 {dimension_numbers = #tpu.dot_dimension_numbers<[1], [0], [0], [1], [0, 0, 1, 1], [], []>} : vector<8x32xf32>, vector<32x128xf32>, vector<8x128xf32> -> vector<8x128xf32>
    %48 = arith.addf %46, %47 : vector<8x128xf32>
    %49 = vector.extract_strided_slice %48 {offsets = [0, 0], sizes = [8, 32], strides = [1, 1]} : vector<8x128xf32> to vector<8x32xf32>
    %50 = arith.negf %49 : vector<8x32xf32>
    %51 = math.exp %50 : vector<8x32xf32>
    %cst_20 = arith.constant 1.000000e+00 : f32
    %52 = vector.broadcast %cst_20 : f32 to vector<8x32xf32>
    %53 = arith.addf %52, %51 : vector<8x32xf32>
    %54 = arith.divf %52, %53 : vector<8x32xf32>
    %55 = vector.extract_strided_slice %48 {offsets = [0, 32], sizes = [8, 32], strides = [1, 1]} : vector<8x128xf32> to vector<8x32xf32>
    %56 = arith.negf %55 : vector<8x32xf32>
    %57 = math.exp %56 : vector<8x32xf32>
    %cst_21 = arith.constant 1.000000e+00 : f32
    %58 = vector.broadcast %cst_21 : f32 to vector<8x32xf32>
    %59 = arith.addf %58, %57 : vector<8x32xf32>
    %60 = arith.divf %58, %59 : vector<8x32xf32>
    %61 = vector.extract_strided_slice %48 {offsets = [0, 64], sizes = [8, 32], strides = [1, 1]} : vector<8x128xf32> to vector<8x32xf32>
    %62 = math.tanh %61 : vector<8x32xf32>
    %63 = vector.extract_strided_slice %48 {offsets = [0, 96], sizes = [8, 32], strides = [1, 1]} : vector<8x128xf32> to vector<8x32xf32>
    %64 = arith.negf %63 : vector<8x32xf32>
    %65 = math.exp %64 : vector<8x32xf32>
    %cst_22 = arith.constant 1.000000e+00 : f32
    %66 = vector.broadcast %cst_22 : f32 to vector<8x32xf32>
    %67 = arith.addf %66, %65 : vector<8x32xf32>
    %68 = arith.divf %66, %67 : vector<8x32xf32>
    %69 = arith.mulf %60, %38 : vector<8x32xf32>
    %70 = arith.mulf %54, %62 : vector<8x32xf32>
    %71 = arith.addf %69, %70 : vector<8x32xf32>
    %72 = math.tanh %71 : vector<8x32xf32>
    %73 = arith.mulf %68, %72 : vector<8x32xf32>
    %74 = arith.index_cast %44 : i32 to index
    %c0_23 = arith.constant 0 : index
    %75 = vector.load %arg12[%74, %c0_23] : memref<64x32xf32, #tpu.memory_space<vmem>>, vector<8x32xf32>
    tpu.vector_store %arg12[%74, %c0_23], %73 {strides = array<i32>} : memref<64x32xf32, #tpu.memory_space<vmem>>, vector<8x32xf32>,
    %c2_i32 = arith.constant 2 : i32
    %c8_i32_24 = arith.constant 8 : i32
    %76 = arith.muli %c2_i32, %c8_i32_24 : i32
    %77 = tpu.assume_multiple %76, 8 : i32
    %78 = arith.index_cast %77 : i32 to index
    %c0_25 = arith.constant 0 : index
    %79 = vector.load %arg13[%78, %c0_25] : memref<64x128xf32, #tpu.memory_space<vmem>>, vector<8x128xf32>
    %cst_26 = arith.constant dense<0.000000e+00> : vector<8x128xf32>
    %80 = tpu.matmul %73, %1, %cst_26 {dimension_numbers = #tpu.dot_dimension_numbers<[1], [0], [0], [1], [0, 0, 1, 1], [], []>} : vector<8x32xf32>, vector<32x128xf32>, vector<8x128xf32> -> vector<8x128xf32>
    %81 = arith.addf %79, %80 : vector<8x128xf32>
    %82 = vector.extract_strided_slice %81 {offsets = [0, 0], sizes = [8, 32], strides = [1, 1]} : vector<8x128xf32> to vector<8x32xf32>
    %83 = arith.negf %82 : vector<8x32xf32>
    %84 = math.exp %83 : vector<8x32xf32>
    %cst_27 = arith.constant 1.000000e+00 : f32
    %85 = vector.broadcast %cst_27 : f32 to vector<8x32xf32>
    %86 = arith.addf %85, %84 : vector<8x32xf32>
    %87 = arith.divf %85, %86 : vector<8x32xf32>
    %88 = vector.extract_strided_slice %81 {offsets = [0, 32], sizes = [8, 32], strides = [1, 1]} : vector<8x128xf32> to vector<8x32xf32>
    %89 = arith.negf %88 : vector<8x32xf32>
    %90 = math.exp %89 : vector<8x32xf32>
    %cst_28 = arith.constant 1.000000e+00 : f32
    %91 = vector.broadcast %cst_28 : f32 to vector<8x32xf32>
    %92 = arith.addf %91, %90 : vector<8x32xf32>
    %93 = arith.divf %91, %92 : vector<8x32xf32>
    %94 = vector.extract_strided_slice %81 {offsets = [0, 64], sizes = [8, 32], strides = [1, 1]} : vector<8x128xf32> to vector<8x32xf32>
    %95 = math.tanh %94 : vector<8x32xf32>
    %96 = vector.extract_strided_slice %81 {offsets = [0, 96], sizes = [8, 32], strides = [1, 1]} : vector<8x128xf32> to vector<8x32xf32>
    %97 = arith.negf %96 : vector<8x32xf32>
    %98 = math.exp %97 : vector<8x32xf32>
    %cst_29 = arith.constant 1.000000e+00 : f32
    %99 = vector.broadcast %cst_29 : f32 to vector<8x32xf32>
    %100 = arith.addf %99, %98 : vector<8x32xf32>
    %101 = arith.divf %99, %100 : vector<8x32xf32>
    %102 = arith.mulf %93, %71 : vector<8x32xf32>
    %103 = arith.mulf %87, %95 : vector<8x32xf32>
    %104 = arith.addf %102, %103 : vector<8x32xf32>
    %105 = math.tanh %104 : vector<8x32xf32>
    %106 = arith.mulf %101, %105 : vector<8x32xf32>
    %107 = arith.index_cast %77 : i32 to index
    %c0_30 = arith.constant 0 : index
    %108 = vector.load %arg12[%107, %c0_30] : memref<64x32xf32, #tpu.memory_space<vmem>>, vector<8x32xf32>
    tpu.vector_store %arg12[%107, %c0_30], %106 {strides = array<i32>} : memref<64x32xf32, #tpu.memory_space<vmem>>, vector<8x32xf32>,
    %c3_i32 = arith.constant 3 : i32
    %c8_i32_31 = arith.constant 8 : i32
    %109 = arith.muli %c3_i32, %c8_i32_31 : i32
    %110 = tpu.assume_multiple %109, 8 : i32
    %111 = arith.index_cast %110 : i32 to index
    %c0_32 = arith.constant 0 : index
    %112 = vector.load %arg13[%111, %c0_32] : memref<64x128xf32, #tpu.memory_space<vmem>>, vector<8x128xf32>
    %cst_33 = arith.constant dense<0.000000e+00> : vector<8x128xf32>
    %113 = tpu.matmul %106, %1, %cst_33 {dimension_numbers = #tpu.dot_dimension_numbers<[1], [0], [0], [1], [0, 0, 1, 1], [], []>} : vector<8x32xf32>, vector<32x128xf32>, vector<8x128xf32> -> vector<8x128xf32>
    %114 = arith.addf %112, %113 : vector<8x128xf32>
    %115 = vector.extract_strided_slice %114 {offsets = [0, 0], sizes = [8, 32], strides = [1, 1]} : vector<8x128xf32> to vector<8x32xf32>
    %116 = arith.negf %115 : vector<8x32xf32>
    %117 = math.exp %116 : vector<8x32xf32>
    %cst_34 = arith.constant 1.000000e+00 : f32
    %118 = vector.broadcast %cst_34 : f32 to vector<8x32xf32>
    %119 = arith.addf %118, %117 : vector<8x32xf32>
    %120 = arith.divf %118, %119 : vector<8x32xf32>
    %121 = vector.extract_strided_slice %114 {offsets = [0, 32], sizes = [8, 32], strides = [1, 1]} : vector<8x128xf32> to vector<8x32xf32>
    %122 = arith.negf %121 : vector<8x32xf32>
    %123 = math.exp %122 : vector<8x32xf32>
    %cst_35 = arith.constant 1.000000e+00 : f32
    %124 = vector.broadcast %cst_35 : f32 to vector<8x32xf32>
    %125 = arith.addf %124, %123 : vector<8x32xf32>
    %126 = arith.divf %124, %125 : vector<8x32xf32>
    %127 = vector.extract_strided_slice %114 {offsets = [0, 64], sizes = [8, 32], strides = [1, 1]} : vector<8x128xf32> to vector<8x32xf32>
    %128 = math.tanh %127 : vector<8x32xf32>
    %129 = vector.extract_strided_slice %114 {offsets = [0, 96], sizes = [8, 32], strides = [1, 1]} : vector<8x128xf32> to vector<8x32xf32>
    %130 = arith.negf %129 : vector<8x32xf32>
    %131 = math.exp %130 : vector<8x32xf32>
    %cst_36 = arith.constant 1.000000e+00 : f32
    %132 = vector.broadcast %cst_36 : f32 to vector<8x32xf32>
    %133 = arith.addf %132, %131 : vector<8x32xf32>
    %134 = arith.divf %132, %133 : vector<8x32xf32>
    %135 = arith.mulf %126, %104 : vector<8x32xf32>
    %136 = arith.mulf %120, %128 : vector<8x32xf32>
    %137 = arith.addf %135, %136 : vector<8x32xf32>
    %138 = math.tanh %137 : vector<8x32xf32>
    %139 = arith.mulf %134, %138 : vector<8x32xf32>
    %140 = arith.index_cast %110 : i32 to index
    %c0_37 = arith.constant 0 : index
    %141 = vector.load %arg12[%140, %c0_37] : memref<64x32xf32, #tpu.memory_space<vmem>>, vector<8x32xf32>
    tpu.vector_store %arg12[%140, %c0_37], %139 {strides = array<i32>} : memref<64x32xf32, #tpu.memory_space<vmem>>, vector<8x32xf32>,
    %c4_i32 = arith.constant 4 : i32
    %c8_i32_38 = arith.constant 8 : i32
    %142 = arith.muli %c4_i32, %c8_i32_38 : i32
    %143 = tpu.assume_multiple %142, 8 : i32
    %144 = arith.index_cast %143 : i32 to index
    %c0_39 = arith.constant 0 : index
    %145 = vector.load %arg13[%144, %c0_39] : memref<64x128xf32, #tpu.memory_space<vmem>>, vector<8x128xf32>
    %cst_40 = arith.constant dense<0.000000e+00> : vector<8x128xf32>
    %146 = tpu.matmul %139, %1, %cst_40 {dimension_numbers = #tpu.dot_dimension_numbers<[1], [0], [0], [1], [0, 0, 1, 1], [], []>} : vector<8x32xf32>, vector<32x128xf32>, vector<8x128xf32> -> vector<8x128xf32>
    %147 = arith.addf %145, %146 : vector<8x128xf32>
    %148 = vector.extract_strided_slice %147 {offsets = [0, 0], sizes = [8, 32], strides = [1, 1]} : vector<8x128xf32> to vector<8x32xf32>
    %149 = arith.negf %148 : vector<8x32xf32>
    %150 = math.exp %149 : vector<8x32xf32>
    %cst_41 = arith.constant 1.000000e+00 : f32
    %151 = vector.broadcast %cst_41 : f32 to vector<8x32xf32>
    %152 = arith.addf %151, %150 : vector<8x32xf32>
    %153 = arith.divf %151, %152 : vector<8x32xf32>
    %154 = vector.extract_strided_slice %147 {offsets = [0, 32], sizes = [8, 32], strides = [1, 1]} : vector<8x128xf32> to vector<8x32xf32>
    %155 = arith.negf %154 : vector<8x32xf32>
    %156 = math.exp %155 : vector<8x32xf32>
    %cst_42 = arith.constant 1.000000e+00 : f32
    %157 = vector.broadcast %cst_42 : f32 to vector<8x32xf32>
    %158 = arith.addf %157, %156 : vector<8x32xf32>
    %159 = arith.divf %157, %158 : vector<8x32xf32>
    %160 = vector.extract_strided_slice %147 {offsets = [0, 64], sizes = [8, 32], strides = [1, 1]} : vector<8x128xf32> to vector<8x32xf32>
    %161 = math.tanh %160 : vector<8x32xf32>
    %162 = vector.extract_strided_slice %147 {offsets = [0, 96], sizes = [8, 32], strides = [1, 1]} : vector<8x128xf32> to vector<8x32xf32>
    %163 = arith.negf %162 : vector<8x32xf32>
    %164 = math.exp %163 : vector<8x32xf32>
    %cst_43 = arith.constant 1.000000e+00 : f32
    %165 = vector.broadcast %cst_43 : f32 to vector<8x32xf32>
    %166 = arith.addf %165, %164 : vector<8x32xf32>
    %167 = arith.divf %165, %166 : vector<8x32xf32>
    %168 = arith.mulf %159, %137 : vector<8x32xf32>
    %169 = arith.mulf %153, %161 : vector<8x32xf32>
    %170 = arith.addf %168, %169 : vector<8x32xf32>
    %171 = math.tanh %170 : vector<8x32xf32>
    %172 = arith.mulf %167, %171 : vector<8x32xf32>
    %173 = arith.index_cast %143 : i32 to index
    %c0_44 = arith.constant 0 : index
    %174 = vector.load %arg12[%173, %c0_44] : memref<64x32xf32, #tpu.memory_space<vmem>>, vector<8x32xf32>
    tpu.vector_store %arg12[%173, %c0_44], %172 {strides = array<i32>} : memref<64x32xf32, #tpu.memory_space<vmem>>, vector<8x32xf32>,
    %c5_i32 = arith.constant 5 : i32
    %c8_i32_45 = arith.constant 8 : i32
    %175 = arith.muli %c5_i32, %c8_i32_45 : i32
    %176 = tpu.assume_multiple %175, 8 : i32
    %177 = arith.index_cast %176 : i32 to index
    %c0_46 = arith.constant 0 : index
    %178 = vector.load %arg13[%177, %c0_46] : memref<64x128xf32, #tpu.memory_space<vmem>>, vector<8x128xf32>
    %cst_47 = arith.constant dense<0.000000e+00> : vector<8x128xf32>
    %179 = tpu.matmul %172, %1, %cst_47 {dimension_numbers = #tpu.dot_dimension_numbers<[1], [0], [0], [1], [0, 0, 1, 1], [], []>} : vector<8x32xf32>, vector<32x128xf32>, vector<8x128xf32> -> vector<8x128xf32>
    %180 = arith.addf %178, %179 : vector<8x128xf32>
    %181 = vector.extract_strided_slice %180 {offsets = [0, 0], sizes = [8, 32], strides = [1, 1]} : vector<8x128xf32> to vector<8x32xf32>
    %182 = arith.negf %181 : vector<8x32xf32>
    %183 = math.exp %182 : vector<8x32xf32>
    %cst_48 = arith.constant 1.000000e+00 : f32
    %184 = vector.broadcast %cst_48 : f32 to vector<8x32xf32>
    %185 = arith.addf %184, %183 : vector<8x32xf32>
    %186 = arith.divf %184, %185 : vector<8x32xf32>
    %187 = vector.extract_strided_slice %180 {offsets = [0, 32], sizes = [8, 32], strides = [1, 1]} : vector<8x128xf32> to vector<8x32xf32>
    %188 = arith.negf %187 : vector<8x32xf32>
    %189 = math.exp %188 : vector<8x32xf32>
    %cst_49 = arith.constant 1.000000e+00 : f32
    %190 = vector.broadcast %cst_49 : f32 to vector<8x32xf32>
    %191 = arith.addf %190, %189 : vector<8x32xf32>
    %192 = arith.divf %190, %191 : vector<8x32xf32>
    %193 = vector.extract_strided_slice %180 {offsets = [0, 64], sizes = [8, 32], strides = [1, 1]} : vector<8x128xf32> to vector<8x32xf32>
    %194 = math.tanh %193 : vector<8x32xf32>
    %195 = vector.extract_strided_slice %180 {offsets = [0, 96], sizes = [8, 32], strides = [1, 1]} : vector<8x128xf32> to vector<8x32xf32>
    %196 = arith.negf %195 : vector<8x32xf32>
    %197 = math.exp %196 : vector<8x32xf32>
    %cst_50 = arith.constant 1.000000e+00 : f32
    %198 = vector.broadcast %cst_50 : f32 to vector<8x32xf32>
    %199 = arith.addf %198, %197 : vector<8x32xf32>
    %200 = arith.divf %198, %199 : vector<8x32xf32>
    %201 = arith.mulf %192, %170 : vector<8x32xf32>
    %202 = arith.mulf %186, %194 : vector<8x32xf32>
    %203 = arith.addf %201, %202 : vector<8x32xf32>
    %204 = math.tanh %203 : vector<8x32xf32>
    %205 = arith.mulf %200, %204 : vector<8x32xf32>
    %206 = arith.index_cast %176 : i32 to index
    %c0_51 = arith.constant 0 : index
    %207 = vector.load %arg12[%206, %c0_51] : memref<64x32xf32, #tpu.memory_space<vmem>>, vector<8x32xf32>
    tpu.vector_store %arg12[%206, %c0_51], %205 {strides = array<i32>} : memref<64x32xf32, #tpu.memory_space<vmem>>, vector<8x32xf32>,
    %c6_i32 = arith.constant 6 : i32
    %c8_i32_52 = arith.constant 8 : i32
    %208 = arith.muli %c6_i32, %c8_i32_52 : i32
    %209 = tpu.assume_multiple %208, 8 : i32
    %210 = arith.index_cast %209 : i32 to index
    %c0_53 = arith.constant 0 : index
    %211 = vector.load %arg13[%210, %c0_53] : memref<64x128xf32, #tpu.memory_space<vmem>>, vector<8x128xf32>
    %cst_54 = arith.constant dense<0.000000e+00> : vector<8x128xf32>
    %212 = tpu.matmul %205, %1, %cst_54 {dimension_numbers = #tpu.dot_dimension_numbers<[1], [0], [0], [1], [0, 0, 1, 1], [], []>} : vector<8x32xf32>, vector<32x128xf32>, vector<8x128xf32> -> vector<8x128xf32>
    %213 = arith.addf %211, %212 : vector<8x128xf32>
    %214 = vector.extract_strided_slice %213 {offsets = [0, 0], sizes = [8, 32], strides = [1, 1]} : vector<8x128xf32> to vector<8x32xf32>
    %215 = arith.negf %214 : vector<8x32xf32>
    %216 = math.exp %215 : vector<8x32xf32>
    %cst_55 = arith.constant 1.000000e+00 : f32
    %217 = vector.broadcast %cst_55 : f32 to vector<8x32xf32>
    %218 = arith.addf %217, %216 : vector<8x32xf32>
    %219 = arith.divf %217, %218 : vector<8x32xf32>
    %220 = vector.extract_strided_slice %213 {offsets = [0, 32], sizes = [8, 32], strides = [1, 1]} : vector<8x128xf32> to vector<8x32xf32>
    %221 = arith.negf %220 : vector<8x32xf32>
    %222 = math.exp %221 : vector<8x32xf32>
    %cst_56 = arith.constant 1.000000e+00 : f32
    %223 = vector.broadcast %cst_56 : f32 to vector<8x32xf32>
    %224 = arith.addf %223, %222 : vector<8x32xf32>
    %225 = arith.divf %223, %224 : vector<8x32xf32>
    %226 = vector.extract_strided_slice %213 {offsets = [0, 64], sizes = [8, 32], strides = [1, 1]} : vector<8x128xf32> to vector<8x32xf32>
    %227 = math.tanh %226 : vector<8x32xf32>
    %228 = vector.extract_strided_slice %213 {offsets = [0, 96], sizes = [8, 32], strides = [1, 1]} : vector<8x128xf32> to vector<8x32xf32>
    %229 = arith.negf %228 : vector<8x32xf32>
    %230 = math.exp %229 : vector<8x32xf32>
    %cst_57 = arith.constant 1.000000e+00 : f32
    %231 = vector.broadcast %cst_57 : f32 to vector<8x32xf32>
    %232 = arith.addf %231, %230 : vector<8x32xf32>
    %233 = arith.divf %231, %232 : vector<8x32xf32>
    %234 = arith.mulf %225, %203 : vector<8x32xf32>
    %235 = arith.mulf %219, %227 : vector<8x32xf32>
    %236 = arith.addf %234, %235 : vector<8x32xf32>
    %237 = math.tanh %236 : vector<8x32xf32>
    %238 = arith.mulf %233, %237 : vector<8x32xf32>
    %239 = arith.index_cast %209 : i32 to index
    %c0_58 = arith.constant 0 : index
    %240 = vector.load %arg12[%239, %c0_58] : memref<64x32xf32, #tpu.memory_space<vmem>>, vector<8x32xf32>
    tpu.vector_store %arg12[%239, %c0_58], %238 {strides = array<i32>} : memref<64x32xf32, #tpu.memory_space<vmem>>, vector<8x32xf32>,
    %c7_i32 = arith.constant 7 : i32
    %c8_i32_59 = arith.constant 8 : i32
    %241 = arith.muli %c7_i32, %c8_i32_59 : i32
    %242 = tpu.assume_multiple %241, 8 : i32
    %243 = arith.index_cast %242 : i32 to index
    %c0_60 = arith.constant 0 : index
    %244 = vector.load %arg13[%243, %c0_60] : memref<64x128xf32, #tpu.memory_space<vmem>>, vector<8x128xf32>
    %cst_61 = arith.constant dense<0.000000e+00> : vector<8x128xf32>
    %245 = tpu.matmul %238, %1, %cst_61 {dimension_numbers = #tpu.dot_dimension_numbers<[1], [0], [0], [1], [0, 0, 1, 1], [], []>} : vector<8x32xf32>, vector<32x128xf32>, vector<8x128xf32> -> vector<8x128xf32>
    %246 = arith.addf %244, %245 : vector<8x128xf32>
    %247 = vector.extract_strided_slice %246 {offsets = [0, 0], sizes = [8, 32], strides = [1, 1]} : vector<8x128xf32> to vector<8x32xf32>
    %248 = arith.negf %247 : vector<8x32xf32>
    %249 = math.exp %248 : vector<8x32xf32>
    %cst_62 = arith.constant 1.000000e+00 : f32
    %250 = vector.broadcast %cst_62 : f32 to vector<8x32xf32>
    %251 = arith.addf %250, %249 : vector<8x32xf32>
    %252 = arith.divf %250, %251 : vector<8x32xf32>
    %253 = vector.extract_strided_slice %246 {offsets = [0, 32], sizes = [8, 32], strides = [1, 1]} : vector<8x128xf32> to vector<8x32xf32>
    %254 = arith.negf %253 : vector<8x32xf32>
    %255 = math.exp %254 : vector<8x32xf32>
    %cst_63 = arith.constant 1.000000e+00 : f32
    %256 = vector.broadcast %cst_63 : f32 to vector<8x32xf32>
    %257 = arith.addf %256, %255 : vector<8x32xf32>
    %258 = arith.divf %256, %257 : vector<8x32xf32>
    %259 = vector.extract_strided_slice %246 {offsets = [0, 64], sizes = [8, 32], strides = [1, 1]} : vector<8x128xf32> to vector<8x32xf32>
    %260 = math.tanh %259 : vector<8x32xf32>
    %261 = vector.extract_strided_slice %246 {offsets = [0, 96], sizes = [8, 32], strides = [1, 1]} : vector<8x128xf32> to vector<8x32xf32>
    %262 = arith.negf %261 : vector<8x32xf32>
    %263 = math.exp %262 : vector<8x32xf32>
    %cst_64 = arith.constant 1.000000e+00 : f32
    %264 = vector.broadcast %cst_64 : f32 to vector<8x32xf32>
    %265 = arith.addf %264, %263 : vector<8x32xf32>
    %266 = arith.divf %264, %265 : vector<8x32xf32>
    %267 = arith.mulf %258, %236 : vector<8x32xf32>
    %268 = arith.mulf %252, %260 : vector<8x32xf32>
    %269 = arith.addf %267, %268 : vector<8x32xf32>
    %270 = math.tanh %269 : vector<8x32xf32>
    %271 = arith.mulf %266, %270 : vector<8x32xf32>
    %272 = arith.index_cast %242 : i32 to index
    %c0_65 = arith.constant 0 : index
    %273 = vector.load %arg12[%272, %c0_65] : memref<64x32xf32, #tpu.memory_space<vmem>>, vector<8x32xf32>
    tpu.vector_store %arg12[%272, %c0_65], %271 {strides = array<i32>} : memref<64x32xf32, #tpu.memory_space<vmem>>, vector<8x32xf32>,
    %c8_i32_66 = arith.constant 8 : i32
    %c0_67 = arith.constant 0 : index
    %c0_68 = arith.constant 0 : index
    %274 = vector.load %arg4[%c0_67, %c0_68] : memref<32x128xf32, #tpu.memory_space<vmem>>, vector<32x128xf32>
    %c0_69 = arith.constant 0 : index
    %c0_70 = arith.constant 0 : index
    %275 = vector.load %arg5[%c0_69, %c0_70] : memref<32x128xf32, #tpu.memory_space<vmem>>, vector<32x128xf32>
    %c0_71 = arith.constant 0 : index
    %c0_72 = arith.constant 0 : index
    %276 = vector.load %arg6[%c0_71, %c0_72] : memref<1x128xf32, #tpu.memory_space<vmem>>, vector<1x128xf32>
    %c0_73 = arith.constant 0 : index
    %c0_74 = arith.constant 0 : index
    %277 = vector.load %arg12[%c0_73, %c0_74] : memref<64x32xf32, #tpu.memory_space<vmem>>, vector<64x32xf32>
    %cst_75 = arith.constant dense<0.000000e+00> : vector<64x128xf32>
    %278 = tpu.matmul %277, %274, %cst_75 {dimension_numbers = #tpu.dot_dimension_numbers<[1], [0], [0], [1], [0, 0, 1, 1], [], []>} : vector<64x32xf32>, vector<32x128xf32>, vector<64x128xf32> -> vector<64x128xf32>
    %279 = vector.broadcast %276 : vector<1x128xf32> to vector<64x128xf32>
    %280 = arith.addf %278, %279 : vector<64x128xf32>
    %c0_76 = arith.constant 0 : index
    %c0_77 = arith.constant 0 : index
    %281 = vector.load %arg13[%c0_76, %c0_77] : memref<64x128xf32, #tpu.memory_space<vmem>>, vector<64x128xf32>
    tpu.vector_store %arg13[%c0_76, %c0_77], %280 {strides = array<i32>} : memref<64x128xf32, #tpu.memory_space<vmem>>, vector<64x128xf32>,
    %cst_78 = arith.constant 0.000000e+00 : f32
    %282 = vector.broadcast %cst_78 : f32 to vector<8x32xf32>
    %cst_79 = arith.constant 0.000000e+00 : f32
    %283 = vector.broadcast %cst_79 : f32 to vector<8x32xf32>
    %c0_i32_80 = arith.constant 0 : i32
    %c8_i32_81 = arith.constant 8 : i32
    %284 = arith.muli %c0_i32_80, %c8_i32_81 : i32
    %285 = tpu.assume_multiple %284, 8 : i32
    %286 = arith.index_cast %285 : i32 to index
    %c0_82 = arith.constant 0 : index
    %287 = vector.load %arg13[%286, %c0_82] : memref<64x128xf32, #tpu.memory_space<vmem>>, vector<8x128xf32>
    %cst_83 = arith.constant dense<0.000000e+00> : vector<8x128xf32>
    %288 = tpu.matmul %282, %275, %cst_83 {dimension_numbers = #tpu.dot_dimension_numbers<[1], [0], [0], [1], [0, 0, 1, 1], [], []>} : vector<8x32xf32>, vector<32x128xf32>, vector<8x128xf32> -> vector<8x128xf32>
    %289 = arith.addf %287, %288 : vector<8x128xf32>
    %290 = vector.extract_strided_slice %289 {offsets = [0, 0], sizes = [8, 32], strides = [1, 1]} : vector<8x128xf32> to vector<8x32xf32>
    %291 = arith.negf %290 : vector<8x32xf32>
    %292 = math.exp %291 : vector<8x32xf32>
    %cst_84 = arith.constant 1.000000e+00 : f32
    %293 = vector.broadcast %cst_84 : f32 to vector<8x32xf32>
    %294 = arith.addf %293, %292 : vector<8x32xf32>
    %295 = arith.divf %293, %294 : vector<8x32xf32>
    %296 = vector.extract_strided_slice %289 {offsets = [0, 32], sizes = [8, 32], strides = [1, 1]} : vector<8x128xf32> to vector<8x32xf32>
    %297 = arith.negf %296 : vector<8x32xf32>
    %298 = math.exp %297 : vector<8x32xf32>
    %cst_85 = arith.constant 1.000000e+00 : f32
    %299 = vector.broadcast %cst_85 : f32 to vector<8x32xf32>
    %300 = arith.addf %299, %298 : vector<8x32xf32>
    %301 = arith.divf %299, %300 : vector<8x32xf32>
    %302 = vector.extract_strided_slice %289 {offsets = [0, 64], sizes = [8, 32], strides = [1, 1]} : vector<8x128xf32> to vector<8x32xf32>
    %303 = math.tanh %302 : vector<8x32xf32>
    %304 = vector.extract_strided_slice %289 {offsets = [0, 96], sizes = [8, 32], strides = [1, 1]} : vector<8x128xf32> to vector<8x32xf32>
    %305 = arith.negf %304 : vector<8x32xf32>
    %306 = math.exp %305 : vector<8x32xf32>
    %cst_86 = arith.constant 1.000000e+00 : f32
    %307 = vector.broadcast %cst_86 : f32 to vector<8x32xf32>
    %308 = arith.addf %307, %306 : vector<8x32xf32>
    %309 = arith.divf %307, %308 : vector<8x32xf32>
    %310 = arith.mulf %301, %283 : vector<8x32xf32>
    %311 = arith.mulf %295, %303 : vector<8x32xf32>
    %312 = arith.addf %310, %311 : vector<8x32xf32>
    %313 = math.tanh %312 : vector<8x32xf32>
    %314 = arith.mulf %309, %313 : vector<8x32xf32>
    %c1_i32_87 = arith.constant 1 : i32
    %c8_i32_88 = arith.constant 8 : i32
    %315 = arith.muli %c1_i32_87, %c8_i32_88 : i32
    %316 = tpu.assume_multiple %315, 8 : i32
    %317 = arith.index_cast %316 : i32 to index
    %c0_89 = arith.constant 0 : index
    %318 = vector.load %arg13[%317, %c0_89] : memref<64x128xf32, #tpu.memory_space<vmem>>, vector<8x128xf32>
    %cst_90 = arith.constant dense<0.000000e+00> : vector<8x128xf32>
    %319 = tpu.matmul %314, %275, %cst_90 {dimension_numbers = #tpu.dot_dimension_numbers<[1], [0], [0], [1], [0, 0, 1, 1], [], []>} : vector<8x32xf32>, vector<32x128xf32>, vector<8x128xf32> -> vector<8x128xf32>
    %320 = arith.addf %318, %319 : vector<8x128xf32>
    %321 = vector.extract_strided_slice %320 {offsets = [0, 0], sizes = [8, 32], strides = [1, 1]} : vector<8x128xf32> to vector<8x32xf32>
    %322 = arith.negf %321 : vector<8x32xf32>
    %323 = math.exp %322 : vector<8x32xf32>
    %cst_91 = arith.constant 1.000000e+00 : f32
    %324 = vector.broadcast %cst_91 : f32 to vector<8x32xf32>
    %325 = arith.addf %324, %323 : vector<8x32xf32>
    %326 = arith.divf %324, %325 : vector<8x32xf32>
    %327 = vector.extract_strided_slice %320 {offsets = [0, 32], sizes = [8, 32], strides = [1, 1]} : vector<8x128xf32> to vector<8x32xf32>
    %328 = arith.negf %327 : vector<8x32xf32>
    %329 = math.exp %328 : vector<8x32xf32>
    %cst_92 = arith.constant 1.000000e+00 : f32
    %330 = vector.broadcast %cst_92 : f32 to vector<8x32xf32>
    %331 = arith.addf %330, %329 : vector<8x32xf32>
    %332 = arith.divf %330, %331 : vector<8x32xf32>
    %333 = vector.extract_strided_slice %320 {offsets = [0, 64], sizes = [8, 32], strides = [1, 1]} : vector<8x128xf32> to vector<8x32xf32>
    %334 = math.tanh %333 : vector<8x32xf32>
    %335 = vector.extract_strided_slice %320 {offsets = [0, 96], sizes = [8, 32], strides = [1, 1]} : vector<8x128xf32> to vector<8x32xf32>
    %336 = arith.negf %335 : vector<8x32xf32>
    %337 = math.exp %336 : vector<8x32xf32>
    %cst_93 = arith.constant 1.000000e+00 : f32
    %338 = vector.broadcast %cst_93 : f32 to vector<8x32xf32>
    %339 = arith.addf %338, %337 : vector<8x32xf32>
    %340 = arith.divf %338, %339 : vector<8x32xf32>
    %341 = arith.mulf %332, %312 : vector<8x32xf32>
    %342 = arith.mulf %326, %334 : vector<8x32xf32>
    %343 = arith.addf %341, %342 : vector<8x32xf32>
    %344 = math.tanh %343 : vector<8x32xf32>
    %345 = arith.mulf %340, %344 : vector<8x32xf32>
    %c2_i32_94 = arith.constant 2 : i32
    %c8_i32_95 = arith.constant 8 : i32
    %346 = arith.muli %c2_i32_94, %c8_i32_95 : i32
    %347 = tpu.assume_multiple %346, 8 : i32
    %348 = arith.index_cast %347 : i32 to index
    %c0_96 = arith.constant 0 : index
    %349 = vector.load %arg13[%348, %c0_96] : memref<64x128xf32, #tpu.memory_space<vmem>>, vector<8x128xf32>
    %cst_97 = arith.constant dense<0.000000e+00> : vector<8x128xf32>
    %350 = tpu.matmul %345, %275, %cst_97 {dimension_numbers = #tpu.dot_dimension_numbers<[1], [0], [0], [1], [0, 0, 1, 1], [], []>} : vector<8x32xf32>, vector<32x128xf32>, vector<8x128xf32> -> vector<8x128xf32>
    %351 = arith.addf %349, %350 : vector<8x128xf32>
    %352 = vector.extract_strided_slice %351 {offsets = [0, 0], sizes = [8, 32], strides = [1, 1]} : vector<8x128xf32> to vector<8x32xf32>
    %353 = arith.negf %352 : vector<8x32xf32>
    %354 = math.exp %353 : vector<8x32xf32>
    %cst_98 = arith.constant 1.000000e+00 : f32
    %355 = vector.broadcast %cst_98 : f32 to vector<8x32xf32>
    %356 = arith.addf %355, %354 : vector<8x32xf32>
    %357 = arith.divf %355, %356 : vector<8x32xf32>
    %358 = vector.extract_strided_slice %351 {offsets = [0, 32], sizes = [8, 32], strides = [1, 1]} : vector<8x128xf32> to vector<8x32xf32>
    %359 = arith.negf %358 : vector<8x32xf32>
    %360 = math.exp %359 : vector<8x32xf32>
    %cst_99 = arith.constant 1.000000e+00 : f32
    %361 = vector.broadcast %cst_99 : f32 to vector<8x32xf32>
    %362 = arith.addf %361, %360 : vector<8x32xf32>
    %363 = arith.divf %361, %362 : vector<8x32xf32>
    %364 = vector.extract_strided_slice %351 {offsets = [0, 64], sizes = [8, 32], strides = [1, 1]} : vector<8x128xf32> to vector<8x32xf32>
    %365 = math.tanh %364 : vector<8x32xf32>
    %366 = vector.extract_strided_slice %351 {offsets = [0, 96], sizes = [8, 32], strides = [1, 1]} : vector<8x128xf32> to vector<8x32xf32>
    %367 = arith.negf %366 : vector<8x32xf32>
    %368 = math.exp %367 : vector<8x32xf32>
    %cst_100 = arith.constant 1.000000e+00 : f32
    %369 = vector.broadcast %cst_100 : f32 to vector<8x32xf32>
    %370 = arith.addf %369, %368 : vector<8x32xf32>
    %371 = arith.divf %369, %370 : vector<8x32xf32>
    %372 = arith.mulf %363, %343 : vector<8x32xf32>
    %373 = arith.mulf %357, %365 : vector<8x32xf32>
    %374 = arith.addf %372, %373 : vector<8x32xf32>
    %375 = math.tanh %374 : vector<8x32xf32>
    %376 = arith.mulf %371, %375 : vector<8x32xf32>
    %c3_i32_101 = arith.constant 3 : i32
    %c8_i32_102 = arith.constant 8 : i32
    %377 = arith.muli %c3_i32_101, %c8_i32_102 : i32
    %378 = tpu.assume_multiple %377, 8 : i32
    %379 = arith.index_cast %378 : i32 to index
    %c0_103 = arith.constant 0 : index
    %380 = vector.load %arg13[%379, %c0_103] : memref<64x128xf32, #tpu.memory_space<vmem>>, vector<8x128xf32>
    %cst_104 = arith.constant dense<0.000000e+00> : vector<8x128xf32>
    %381 = tpu.matmul %376, %275, %cst_104 {dimension_numbers = #tpu.dot_dimension_numbers<[1], [0], [0], [1], [0, 0, 1, 1], [], []>} : vector<8x32xf32>, vector<32x128xf32>, vector<8x128xf32> -> vector<8x128xf32>
    %382 = arith.addf %380, %381 : vector<8x128xf32>
    %383 = vector.extract_strided_slice %382 {offsets = [0, 0], sizes = [8, 32], strides = [1, 1]} : vector<8x128xf32> to vector<8x32xf32>
    %384 = arith.negf %383 : vector<8x32xf32>
    %385 = math.exp %384 : vector<8x32xf32>
    %cst_105 = arith.constant 1.000000e+00 : f32
    %386 = vector.broadcast %cst_105 : f32 to vector<8x32xf32>
    %387 = arith.addf %386, %385 : vector<8x32xf32>
    %388 = arith.divf %386, %387 : vector<8x32xf32>
    %389 = vector.extract_strided_slice %382 {offsets = [0, 32], sizes = [8, 32], strides = [1, 1]} : vector<8x128xf32> to vector<8x32xf32>
    %390 = arith.negf %389 : vector<8x32xf32>
    %391 = math.exp %390 : vector<8x32xf32>
    %cst_106 = arith.constant 1.000000e+00 : f32
    %392 = vector.broadcast %cst_106 : f32 to vector<8x32xf32>
    %393 = arith.addf %392, %391 : vector<8x32xf32>
    %394 = arith.divf %392, %393 : vector<8x32xf32>
    %395 = vector.extract_strided_slice %382 {offsets = [0, 64], sizes = [8, 32], strides = [1, 1]} : vector<8x128xf32> to vector<8x32xf32>
    %396 = math.tanh %395 : vector<8x32xf32>
    %397 = vector.extract_strided_slice %382 {offsets = [0, 96], sizes = [8, 32], strides = [1, 1]} : vector<8x128xf32> to vector<8x32xf32>
    %398 = arith.negf %397 : vector<8x32xf32>
    %399 = math.exp %398 : vector<8x32xf32>
    %cst_107 = arith.constant 1.000000e+00 : f32
    %400 = vector.broadcast %cst_107 : f32 to vector<8x32xf32>
    %401 = arith.addf %400, %399 : vector<8x32xf32>
    %402 = arith.divf %400, %401 : vector<8x32xf32>
    %403 = arith.mulf %394, %374 : vector<8x32xf32>
    %404 = arith.mulf %388, %396 : vector<8x32xf32>
    %405 = arith.addf %403, %404 : vector<8x32xf32>
    %406 = math.tanh %405 : vector<8x32xf32>
    %407 = arith.mulf %402, %406 : vector<8x32xf32>
    %c4_i32_108 = arith.constant 4 : i32
    %c8_i32_109 = arith.constant 8 : i32
    %408 = arith.muli %c4_i32_108, %c8_i32_109 : i32
    %409 = tpu.assume_multiple %408, 8 : i32
    %410 = arith.index_cast %409 : i32 to index
    %c0_110 = arith.constant 0 : index
    %411 = vector.load %arg13[%410, %c0_110] : memref<64x128xf32, #tpu.memory_space<vmem>>, vector<8x128xf32>
    %cst_111 = arith.constant dense<0.000000e+00> : vector<8x128xf32>
    %412 = tpu.matmul %407, %275, %cst_111 {dimension_numbers = #tpu.dot_dimension_numbers<[1], [0], [0], [1], [0, 0, 1, 1], [], []>} : vector<8x32xf32>, vector<32x128xf32>, vector<8x128xf32> -> vector<8x128xf32>
    %413 = arith.addf %411, %412 : vector<8x128xf32>
    %414 = vector.extract_strided_slice %413 {offsets = [0, 0], sizes = [8, 32], strides = [1, 1]} : vector<8x128xf32> to vector<8x32xf32>
    %415 = arith.negf %414 : vector<8x32xf32>
    %416 = math.exp %415 : vector<8x32xf32>
    %cst_112 = arith.constant 1.000000e+00 : f32
    %417 = vector.broadcast %cst_112 : f32 to vector<8x32xf32>
    %418 = arith.addf %417, %416 : vector<8x32xf32>
    %419 = arith.divf %417, %418 : vector<8x32xf32>
    %420 = vector.extract_strided_slice %413 {offsets = [0, 32], sizes = [8, 32], strides = [1, 1]} : vector<8x128xf32> to vector<8x32xf32>
    %421 = arith.negf %420 : vector<8x32xf32>
    %422 = math.exp %421 : vector<8x32xf32>
    %cst_113 = arith.constant 1.000000e+00 : f32
    %423 = vector.broadcast %cst_113 : f32 to vector<8x32xf32>
    %424 = arith.addf %423, %422 : vector<8x32xf32>
    %425 = arith.divf %423, %424 : vector<8x32xf32>
    %426 = vector.extract_strided_slice %413 {offsets = [0, 64], sizes = [8, 32], strides = [1, 1]} : vector<8x128xf32> to vector<8x32xf32>
    %427 = math.tanh %426 : vector<8x32xf32>
    %428 = vector.extract_strided_slice %413 {offsets = [0, 96], sizes = [8, 32], strides = [1, 1]} : vector<8x128xf32> to vector<8x32xf32>
    %429 = arith.negf %428 : vector<8x32xf32>
    %430 = math.exp %429 : vector<8x32xf32>
    %cst_114 = arith.constant 1.000000e+00 : f32
    %431 = vector.broadcast %cst_114 : f32 to vector<8x32xf32>
    %432 = arith.addf %431, %430 : vector<8x32xf32>
    %433 = arith.divf %431, %432 : vector<8x32xf32>
    %434 = arith.mulf %425, %405 : vector<8x32xf32>
    %435 = arith.mulf %419, %427 : vector<8x32xf32>
    %436 = arith.addf %434, %435 : vector<8x32xf32>
    %437 = math.tanh %436 : vector<8x32xf32>
    %438 = arith.mulf %433, %437 : vector<8x32xf32>
    %c5_i32_115 = arith.constant 5 : i32
    %c8_i32_116 = arith.constant 8 : i32
    %439 = arith.muli %c5_i32_115, %c8_i32_116 : i32
    %440 = tpu.assume_multiple %439, 8 : i32
    %441 = arith.index_cast %440 : i32 to index
    %c0_117 = arith.constant 0 : index
    %442 = vector.load %arg13[%441, %c0_117] : memref<64x128xf32, #tpu.memory_space<vmem>>, vector<8x128xf32>
    %cst_118 = arith.constant dense<0.000000e+00> : vector<8x128xf32>
    %443 = tpu.matmul %438, %275, %cst_118 {dimension_numbers = #tpu.dot_dimension_numbers<[1], [0], [0], [1], [0, 0, 1, 1], [], []>} : vector<8x32xf32>, vector<32x128xf32>, vector<8x128xf32> -> vector<8x128xf32>
    %444 = arith.addf %442, %443 : vector<8x128xf32>
    %445 = vector.extract_strided_slice %444 {offsets = [0, 0], sizes = [8, 32], strides = [1, 1]} : vector<8x128xf32> to vector<8x32xf32>
    %446 = arith.negf %445 : vector<8x32xf32>
    %447 = math.exp %446 : vector<8x32xf32>
    %cst_119 = arith.constant 1.000000e+00 : f32
    %448 = vector.broadcast %cst_119 : f32 to vector<8x32xf32>
    %449 = arith.addf %448, %447 : vector<8x32xf32>
    %450 = arith.divf %448, %449 : vector<8x32xf32>
    %451 = vector.extract_strided_slice %444 {offsets = [0, 32], sizes = [8, 32], strides = [1, 1]} : vector<8x128xf32> to vector<8x32xf32>
    %452 = arith.negf %451 : vector<8x32xf32>
    %453 = math.exp %452 : vector<8x32xf32>
    %cst_120 = arith.constant 1.000000e+00 : f32
    %454 = vector.broadcast %cst_120 : f32 to vector<8x32xf32>
    %455 = arith.addf %454, %453 : vector<8x32xf32>
    %456 = arith.divf %454, %455 : vector<8x32xf32>
    %457 = vector.extract_strided_slice %444 {offsets = [0, 64], sizes = [8, 32], strides = [1, 1]} : vector<8x128xf32> to vector<8x32xf32>
    %458 = math.tanh %457 : vector<8x32xf32>
    %459 = vector.extract_strided_slice %444 {offsets = [0, 96], sizes = [8, 32], strides = [1, 1]} : vector<8x128xf32> to vector<8x32xf32>
    %460 = arith.negf %459 : vector<8x32xf32>
    %461 = math.exp %460 : vector<8x32xf32>
    %cst_121 = arith.constant 1.000000e+00 : f32
    %462 = vector.broadcast %cst_121 : f32 to vector<8x32xf32>
    %463 = arith.addf %462, %461 : vector<8x32xf32>
    %464 = arith.divf %462, %463 : vector<8x32xf32>
    %465 = arith.mulf %456, %436 : vector<8x32xf32>
    %466 = arith.mulf %450, %458 : vector<8x32xf32>
    %467 = arith.addf %465, %466 : vector<8x32xf32>
    %468 = math.tanh %467 : vector<8x32xf32>
    %469 = arith.mulf %464, %468 : vector<8x32xf32>
    %c6_i32_122 = arith.constant 6 : i32
    %c8_i32_123 = arith.constant 8 : i32
    %470 = arith.muli %c6_i32_122, %c8_i32_123 : i32
    %471 = tpu.assume_multiple %470, 8 : i32
    %472 = arith.index_cast %471 : i32 to index
    %c0_124 = arith.constant 0 : index
    %473 = vector.load %arg13[%472, %c0_124] : memref<64x128xf32, #tpu.memory_space<vmem>>, vector<8x128xf32>
    %cst_125 = arith.constant dense<0.000000e+00> : vector<8x128xf32>
    %474 = tpu.matmul %469, %275, %cst_125 {dimension_numbers = #tpu.dot_dimension_numbers<[1], [0], [0], [1], [0, 0, 1, 1], [], []>} : vector<8x32xf32>, vector<32x128xf32>, vector<8x128xf32> -> vector<8x128xf32>
    %475 = arith.addf %473, %474 : vector<8x128xf32>
    %476 = vector.extract_strided_slice %475 {offsets = [0, 0], sizes = [8, 32], strides = [1, 1]} : vector<8x128xf32> to vector<8x32xf32>
    %477 = arith.negf %476 : vector<8x32xf32>
    %478 = math.exp %477 : vector<8x32xf32>
    %cst_126 = arith.constant 1.000000e+00 : f32
    %479 = vector.broadcast %cst_126 : f32 to vector<8x32xf32>
    %480 = arith.addf %479, %478 : vector<8x32xf32>
    %481 = arith.divf %479, %480 : vector<8x32xf32>
    %482 = vector.extract_strided_slice %475 {offsets = [0, 32], sizes = [8, 32], strides = [1, 1]} : vector<8x128xf32> to vector<8x32xf32>
    %483 = arith.negf %482 : vector<8x32xf32>
    %484 = math.exp %483 : vector<8x32xf32>
    %cst_127 = arith.constant 1.000000e+00 : f32
    %485 = vector.broadcast %cst_127 : f32 to vector<8x32xf32>
    %486 = arith.addf %485, %484 : vector<8x32xf32>
    %487 = arith.divf %485, %486 : vector<8x32xf32>
    %488 = vector.extract_strided_slice %475 {offsets = [0, 64], sizes = [8, 32], strides = [1, 1]} : vector<8x128xf32> to vector<8x32xf32>
    %489 = math.tanh %488 : vector<8x32xf32>
    %490 = vector.extract_strided_slice %475 {offsets = [0, 96], sizes = [8, 32], strides = [1, 1]} : vector<8x128xf32> to vector<8x32xf32>
    %491 = arith.negf %490 : vector<8x32xf32>
    %492 = math.exp %491 : vector<8x32xf32>
    %cst_128 = arith.constant 1.000000e+00 : f32
    %493 = vector.broadcast %cst_128 : f32 to vector<8x32xf32>
    %494 = arith.addf %493, %492 : vector<8x32xf32>
    %495 = arith.divf %493, %494 : vector<8x32xf32>
    %496 = arith.mulf %487, %467 : vector<8x32xf32>
    %497 = arith.mulf %481, %489 : vector<8x32xf32>
    %498 = arith.addf %496, %497 : vector<8x32xf32>
    %499 = math.tanh %498 : vector<8x32xf32>
    %500 = arith.mulf %495, %499 : vector<8x32xf32>
    %c7_i32_129 = arith.constant 7 : i32
    %c8_i32_130 = arith.constant 8 : i32
    %501 = arith.muli %c7_i32_129, %c8_i32_130 : i32
    %502 = tpu.assume_multiple %501, 8 : i32
    %503 = arith.index_cast %502 : i32 to index
    %c0_131 = arith.constant 0 : index
    %504 = vector.load %arg13[%503, %c0_131] : memref<64x128xf32, #tpu.memory_space<vmem>>, vector<8x128xf32>
    %cst_132 = arith.constant dense<0.000000e+00> : vector<8x128xf32>
    %505 = tpu.matmul %500, %275, %cst_132 {dimension_numbers = #tpu.dot_dimension_numbers<[1], [0], [0], [1], [0, 0, 1, 1], [], []>} : vector<8x32xf32>, vector<32x128xf32>, vector<8x128xf32> -> vector<8x128xf32>
    %506 = arith.addf %504, %505 : vector<8x128xf32>
    %507 = vector.extract_strided_slice %506 {offsets = [0, 0], sizes = [8, 32], strides = [1, 1]} : vector<8x128xf32> to vector<8x32xf32>
    %508 = arith.negf %507 : vector<8x32xf32>
    %509 = math.exp %508 : vector<8x32xf32>
    %cst_133 = arith.constant 1.000000e+00 : f32
    %510 = vector.broadcast %cst_133 : f32 to vector<8x32xf32>
    %511 = arith.addf %510, %509 : vector<8x32xf32>
    %512 = arith.divf %510, %511 : vector<8x32xf32>
    %513 = vector.extract_strided_slice %506 {offsets = [0, 32], sizes = [8, 32], strides = [1, 1]} : vector<8x128xf32> to vector<8x32xf32>
    %514 = arith.negf %513 : vector<8x32xf32>
    %515 = math.exp %514 : vector<8x32xf32>
    %cst_134 = arith.constant 1.000000e+00 : f32
    %516 = vector.broadcast %cst_134 : f32 to vector<8x32xf32>
    %517 = arith.addf %516, %515 : vector<8x32xf32>
    %518 = arith.divf %516, %517 : vector<8x32xf32>
    %519 = vector.extract_strided_slice %506 {offsets = [0, 64], sizes = [8, 32], strides = [1, 1]} : vector<8x128xf32> to vector<8x32xf32>
    %520 = math.tanh %519 : vector<8x32xf32>
    %521 = vector.extract_strided_slice %506 {offsets = [0, 96], sizes = [8, 32], strides = [1, 1]} : vector<8x128xf32> to vector<8x32xf32>
    %522 = arith.negf %521 : vector<8x32xf32>
    %523 = math.exp %522 : vector<8x32xf32>
    %cst_135 = arith.constant 1.000000e+00 : f32
    %524 = vector.broadcast %cst_135 : f32 to vector<8x32xf32>
    %525 = arith.addf %524, %523 : vector<8x32xf32>
    %526 = arith.divf %524, %525 : vector<8x32xf32>
    %527 = arith.mulf %518, %498 : vector<8x32xf32>
    %528 = arith.mulf %512, %520 : vector<8x32xf32>
    %529 = arith.addf %527, %528 : vector<8x32xf32>
    %530 = math.tanh %529 : vector<8x32xf32>
    %531 = arith.mulf %526, %530 : vector<8x32xf32>
    %c8_i32_136 = arith.constant 8 : i32
    %cst_137 = arith.constant 0.000000e+00 : f32
    %532 = vector.broadcast %cst_137 : f32 to vector<8x32xf32>
    %533 = arith.maximumf %531, %532 : vector<8x32xf32>
    %c0_138 = arith.constant 0 : index
    %c0_139 = arith.constant 0 : index
    %534 = vector.load %arg7[%c0_138, %c0_139] : memref<32x128xf32, #tpu.memory_space<vmem>>, vector<32x128xf32>
    %cst_140 = arith.constant dense<0.000000e+00> : vector<8x128xf32>
    %535 = tpu.matmul %533, %534, %cst_140 {dimension_numbers = #tpu.dot_dimension_numbers<[1], [0], [0], [1], [0, 0, 1, 1], [], []>} : vector<8x32xf32>, vector<32x128xf32>, vector<8x128xf32> -> vector<8x128xf32>
    %c0_141 = arith.constant 0 : index
    %c0_142 = arith.constant 0 : index
    %536 = vector.load %arg8[%c0_141, %c0_142] : memref<1x128xf32, #tpu.memory_space<vmem>>, vector<1x128xf32>
    %537 = vector.broadcast %536 : vector<1x128xf32> to vector<8x128xf32>
    %538 = arith.addf %535, %537 : vector<8x128xf32>
    %cst_143 = arith.constant 0.000000e+00 : f32
    %539 = vector.broadcast %cst_143 : f32 to vector<8x128xf32>
    %540 = arith.maximumf %538, %539 : vector<8x128xf32>
    %c0_144 = arith.constant 0 : index
    %c0_145 = arith.constant 0 : index
    %541 = vector.load %arg9[%c0_144, %c0_145] : memref<128x4xf32, #tpu.memory_space<vmem>>, vector<128x4xf32>
    %cst_146 = arith.constant dense<0.000000e+00> : vector<8x4xf32>
    %542 = tpu.matmul %540, %541, %cst_146 {dimension_numbers = #tpu.dot_dimension_numbers<[1], [0], [0], [1], [0, 0, 1, 1], [], []>} : vector<8x128xf32>, vector<128x4xf32>, vector<8x4xf32> -> vector<8x4xf32>
    %c0_147 = arith.constant 0 : index
    %c0_148 = arith.constant 0 : index
    %543 = vector.load %arg10[%c0_147, %c0_148] : memref<1x4xf32, #tpu.memory_space<vmem>>, vector<1x4xf32>
    %544 = vector.broadcast %543 : vector<1x4xf32> to vector<8x4xf32>
    %545 = arith.addf %542, %544 : vector<8x4xf32>
    %c0_149 = arith.constant 0 : index
    %c0_150 = arith.constant 0 : index
    %546 = vector.load %arg11[%c0_149, %c0_150] : memref<8x4xf32, #tpu.memory_space<vmem>>, vector<8x4xf32>
    tpu.vector_store %arg11[%c0_149, %c0_150], %545 {strides = array<i32>} : memref<8x4xf32, #tpu.memory_space<vmem>>, vector<8x4xf32>,
    return
  }
}

</mosaic_0001>

<bundles_post_ra>
// kernel: tpu_custom_call.1
= control target key start
LH: loop header
LB: loop body
LE: loop exit
PB: predicated region body
PF: predicated region fallthrough
CT: control target
= control target key end

     0   :  { %vm58_vm0 = vcmask 64512   ;;  %v2748_v3 = vmov 0.0   ;;  %vm2749_vm1 = vmmov 0   ;;  %s2751_s23 = smov 32   ;;  %vm197_vm2 = vcmask 261120   ;;  %s3302_s1 = inlined_call_operand.vmem [shape: f32[8,128], index: 1, kind: input, shape index: {}]   ;;  %s3303_s0 = inlined_call_operand.vmem [shape: f32[64,8], index: 0, kind: input, shape index: {}]   ;;  %s3304_s2 = inlined_call_operand.vmem [shape: f32[32,128], index: 2, kind: input, shape index: {}]   ;;  %s3305_s3 = inlined_call_operand.vmem [shape: f32[1,128], index: 3, kind: input, shape index: {}]   ;;  %s3306_s4 = inlined_call_operand.vmem [shape: f32[32,128], index: 4, kind: input, shape index: {}]   ;;  %s3307_s5 = inlined_call_operand.vmem [shape: f32[32,128], index: 5, kind: input, shape index: {}]   ;;  %s3308_s6 = inlined_call_operand.vmem [shape: f32[1,128], index: 6, kind: input, shape index: {}]   ;;  %s3309_s7 = inlined_call_operand.vmem [shape: f32[32,128], index: 7, kind: input, shape index: {}]   ;;  %s3310_s9 = inlined_call_operand.vmem [shape: f32[128,4], index: 9, kind: input, shape index: {}]   ;;  %s3311_s8 = inlined_call_operand.vmem [shape: f32[1,128], index: 8, kind: input, shape index: {}]   ;;  %s3312_s10 = inlined_call_operand.vmem [shape: f32[1,4], index: 10, kind: input, shape index: {}]   ;;  %s3313_s11 = inlined_call_operand.vmem [shape: f32[8,4], index: 11, kind: output, shape index: {}]  }
   0x1   :  { %v38_v0 = vld [vmem:[%s3302_s1] sm:$0xff]  ;;  %v45_v2 = vld [vmem:[%s3303_s0 + $0x8] sm:$0xff]  ;;  %2407 = vmatprep.subr.mxu1 %v2748_v3  ;;  %2415 = vmatprep.mubr.msk.f32.mxu1 %vm2749_vm1, %v2748_v3  ;;  %v2828_v4 = vld [vmem:[%s3304_s2 + $0x18] sm:$0xff]  ;;  %vm2180_vm3 = vcmask 31744  }
   0x2   :  { %v44_v1 = vld [vmem:[%s3303_s0] sm:$0xff]  ;;  %2360 = vmatprep.subr.mxu0 %v38_v0  ;;  %v46_v5 = vld [vmem:[%s3303_s0 + $0x10] sm:$0xff]  ;;  %2408 = vmatpush3.msra.mxu1 %v2828_v4  ;;  %v47_v7 = vld [vmem:[%s3303_s0 + $0x18] sm:$0xff] }
   0x3   :  { %2362 = vmatprep.mubr.msk.f32.mxu0 %vm58_vm0, %v44_v1  ;;  %2361 = vmatpush3.msra.mxu0 %v38_v0  ;;  %v2839_v6 = vld [vmem:[%s3304_s2 + $0x10] sm:$0xff]  ;;  %v48_v8 = vld [vmem:[%s3303_s0 + $0x20] sm:$0xff]  ;;  %v2853_v9 = vld [vmem:[%s3304_s2 + $0x8] sm:$0xff] }
   0x4   :  { %2363 = vmatmul.mubr.msk.f32.vlgmr.msra.gmra.mxu0 %vm58_vm0, %v45_v2  ;;  %2374 = vmatprep.subr.mxu0 %v2748_v3  ;;  %v2863_v10 = vld [vmem:[%s3304_s2] sm:$0xff]  ;;  %v49_v11 = vld [vmem:[%s3303_s0 + $0x28] sm:$0xff]  ;;  %v50_v12 = vld [vmem:[%s3303_s0 + $0x30] sm:$0xff] }
   0x5   :  { %2375 = vmatpush3.msra.mxu0 %v2828_v4  ;;  %2365 = vmatprep.mubr.msk.f32.mxu0 %vm58_vm0, %v46_v5  ;;  %v51_v13 = vld [vmem:[%s3303_s0 + $0x38] sm:$0xff]  ;;  %v2186_v14 = vld [vmem:[%s3305_s3] ss:$0 sm:$0xff]  ;;  %s2750_s3 = smov 64  }
   0x6   :  { %2376 = vmatprep.subr.mxu0 %v2748_v3  ;;  %2409 = vmatprep.subr.mxu1 %v2748_v3 }
   0x7   :  { %2377 = vmatpush3.msra.mxu0 %v2839_v6  ;;  %2410 = vmatpush3.msra.mxu1 %v2839_v6 }
   0x8   :  { %2366 = vmatmul.mubr.msk.f32.gmra.mxu0 %vm58_vm0, %v47_v7  ;;  %2378 = vmatprep.subr.mxu0 %v2748_v3 }
   0x9   :  { %2368 = vmatprep.mubr.msk.f32.mxu0 %vm58_vm0, %v48_v8  ;;  %2379 = vmatpush3.msra.mxu0 %v2853_v9 }
   0xa   :  { %2380 = vmatprep.subr.mxu0 %v2748_v3  ;;  %2411 = vmatprep.subr.mxu1 %v2748_v3 }
   0xb   :  { %2381 = vmatpush3.msra.mxu0 %v2863_v10  ;;  %2412 = vmatpush3.msra.mxu1 %v2853_v9 }
   0xc   :  { %2369 = vmatmul.mubr.msk.f32.gmra.mxu0 %vm58_vm0, %v49_v11  ;;  %2385 = vmatprep.subr.mxu0 %v2748_v3 }
   0xd   :  { %2371 = vmatprep.mubr.msk.f32.mxu0 %vm58_vm0, %v50_v12  ;;  %2413 = vmatprep.subr.mxu1 %v2748_v3 }
   0xe   :  { %2414 = vmatpush3.msra.mxu1 %v2863_v10 }
   0xf   :  { %2429 = vmatprep.subr.mxu1 %v2748_v3 }
  0x10   :  { %2372 = vmatmul.mubr.msk.f32.gmra.mxu0 %vm58_vm0, %v51_v13 }
  0x11   :  { %2382 = vmatprep.mubr.msk.f32.mxu0 %vm2749_vm1, %v2748_v3 }
  0x14   :  { %2383 = vmatmul.mubr.f32.vlgmr.msra.gmra.mxu0 %v2748_v3 }
  0x15   :  { %2386 = vmatpush3.msra.mxu0 %v2828_v4  ;;  %2393 = vmatprep.mubr.msk.f32.mxu0 %vm2749_vm1, %v2748_v3 }
  0x16   :  { %2387 = vmatprep.subr.mxu0 %v2748_v3 }
  0x17   :  { %2388 = vmatpush3.msra.mxu0 %v2839_v6 }
  0x18   :  { %2389 = vmatprep.subr.mxu0 %v2748_v3 }
  0x19   :  { %2390 = vmatpush3.msra.mxu0 %v2853_v9 }
  0x1a   :  { %2391 = vmatprep.subr.mxu0 %v2748_v3 }
  0x1b   :  { %2392 = vmatpush3.msra.mxu0 %v2863_v10 }
  0x1c   :  { %2396 = vmatprep.subr.mxu0 %v2748_v3 }
  0xc4   :  { %v2364_v15 = vpop.f32.mrf.mxu0 }
  0xc5   :  { %v155_v16 = vadd.f32 %v2364_v15, %v2186_v14 }
  0xc6   :  { %v149_v17 = vpop.f32.mrf.mxu0 }
  0xc7   :  { %v150_v29 = vadd.f32 %v2186_v14, %v149_v17 }
  0xc8   :  { %v2367_v18 = vpop.f32.mrf.mxu0 }
  0xc9   :  { %v2903_v19 = vadd.f32 %v2367_v18, %v2186_v14 }
  0xca   :  { %v159_v20 = vpop.f32.mrf.mxu0 }
  0xcb   :  { %v2905_v21 = vadd.f32 %v2186_v14, %v159_v20 }
  0xcc   :  { %v2370_v22 = vpop.f32.mrf.mxu0 }
  0xcd   :  { %v2907_v23 = vadd.f32 %v2370_v22, %v2186_v14 }
  0xce   :  { %v169_v24 = vpop.f32.mrf.mxu0 }
  0xcf   :  { %v2909_v25 = vadd.f32 %v2186_v14, %v169_v24 }
  0xd0   :  { %v2373_v26 = vpop.f32.mrf.mxu0 }
  0xd1   :  { %v2911_v27 = vadd.f32 %v2373_v26, %v2186_v14 }
  0xd2   :  { %v179_v28 = vpop.f32.mrf.mxu0 }
  0xd3   :  { %v2913_v30 = vadd.f32 %v2186_v14, %v179_v28 }
  0xd4   :  { %v267_v31 = vpop.f32.mrf.mxu0 }
  0xd5   :  { %v271_v32 = vadd.f32 %v267_v31, %v150_v29 }
  0xd6   :  { %v2384_v33 = vpop.f32.mrf.mxu0 }
  0xd7   :  { %2620 = vtanh.f32 %v271_v32  ;;  %v2195_v35 = vmul.f32 -1.442695, %v271_v32 }
  0xd9   :  { %2622 = vpow2.f32 %v2195_v35 }
  0xe4   :  { %v2621_v34 = vpop.eup %2620 }
  0xe5   :  { %281 = vrot.lane.b32.xlu0 %v2621_v34, %s2750_s3 }
  0xe6   :  { %v2623_v36 = vpop.eup %2622 }
  0xe7   :  { %v275_v37 = vadd.f32 1.0, %v2623_v36 }
  0xe9   :  { %2624 = vrcp.f32 %v275_v37 }
  0xf6   :  { %v2625_v38 = vpop.eup %2624 }
  0xf7   :  { %v279_v41 = vmul.f32 0.0, %v2625_v38 }
 0x157   :  { %v282_v39 = vpop.permute.xlu0 %281 }
 0x158   :  { %v284_v40 = vmul.f32 %v2625_v38, %v282_v39 }
 0x15a   :  { %286 = vrot.lane.b32.xlu0 %v284_v40, %s2751_s23 }
 0x1cc   :  { %v287_v42 = vpop.permute.xlu0 %286 }
 0x1cd   :  { %v289_v43 = vadd.f32 %v287_v42, %v279_v41 }
 0x1cf   :  { %2626 = vtanh.f32 %v289_v43 }
 0x1dc   :  { %v2627_v44 = vpop.eup %2626 }
 0x1dd   :  { %292 = vrot.lane.b32.xlu1 %v2627_v44, %s2750_s3 }
 0x24f   :  { %v293_v45 = vpop.permute.xlu1 %292 }
 0x250   :  { %v295_v46 = vmul.f32 %v2625_v38, %v293_v45 }
 0x252   :  { %297 = vrot.lane.b32.xlu1 %v295_v46, %s2751_s23 }
 0x2c4   :  { %v298_v47 = vpop.permute.xlu1 %297 }
 0x2c5   :  { %300 = vst.msk [vmem:[#allocation2] sm:$0xff] %vm197_vm2, %v298_v47  ;;  %2394 = vmatmul.mubr.msk.f32.vlgmr.msra.gmra.mxu0 %vm197_vm2, %v298_v47 }
 0x2c6   :  { %2397 = vmatpush3.msra.mxu0 %v2828_v4  ;;  %2404 = vmatprep.mubr.msk.f32.mxu0 %vm2749_vm1, %v2748_v3 }
 0x2c7   :  { %2398 = vmatprep.subr.mxu0 %v2748_v3 }
 0x2c8   :  { %2399 = vmatpush3.msra.mxu0 %v2839_v6 }
 0x2c9   :  { %2400 = vmatprep.subr.mxu0 %v2748_v3 }
 0x2ca   :  { %2401 = vmatpush3.msra.mxu0 %v2853_v9 }
 0x2cb   :  { %2402 = vmatprep.subr.mxu0 %v2748_v3 }
 0x2cc   :  { %2403 = vmatpush3.msra.mxu0 %v2863_v10 }
 0x2cd   :  { %2418 = vmatprep.subr.mxu0 %v2748_v3 }
 0x385   :  { %v371_v48 = vpop.f32.mrf.mxu0 }
 0x386   :  { %v375_v49 = vadd.f32 %v371_v48, %v155_v16 }
 0x387   :  { %v2395_v50 = vpop.f32.mrf.mxu0 }
 0x388   :  { %2628 = vtanh.f32 %v375_v49  ;;  %v2197_v52 = vmul.f32 -1.442695, %v375_v49 }
 0x38a   :  { %2630 = vpow2.f32 %v2197_v52 }
 0x395   :  { %v2629_v51 = vpop.eup %2628 }
 0x396   :  { %385 = vrot.lane.b32.xlu0 %v2629_v51, %s2750_s3 }
 0x397   :  { %v2631_v53 = vpop.eup %2630 }
 0x398   :  { %v379_v54 = vadd.f32 1.0, %v2631_v53 }
 0x39a   :  { %2632 = vrcp.f32 %v379_v54 }
 0x3a7   :  { %v2633_v55 = vpop.eup %2632 }
 0x3a8   :  { %v383_v58 = vmul.f32 %v2633_v55, %v289_v43 }
 0x408   :  { %v386_v56 = vpop.permute.xlu0 %385 }
 0x409   :  { %v388_v57 = vmul.f32 %v2633_v55, %v386_v56 }
 0x40b   :  { %390 = vrot.lane.b32.xlu1 %v388_v57, %s2751_s23 }
 0x47d   :  { %v391_v59 = vpop.permute.xlu1 %390 }
 0x47e   :  { %v393_v60 = vadd.f32 %v391_v59, %v383_v58 }
 0x480   :  { %2634 = vtanh.f32 %v393_v60 }
 0x48d   :  { %v2635_v61 = vpop.eup %2634 }
 0x48e   :  { %396 = vrot.lane.b32.xlu0 %v2635_v61, %s2750_s3 }
 0x500   :  { %v397_v62 = vpop.permute.xlu0 %396 }
 0x501   :  { %v399_v63 = vmul.f32 %v2633_v55, %v397_v62 }
 0x503   :  { %401 = vrot.lane.b32.xlu1 %v399_v63, %s2751_s23 }
 0x575   :  { %v402_v0 = vpop.permute.xlu1 %401 }
 0x576   :  { %405 = vst.msk [vmem:[#allocation2 + $0x8] sm:$0xff] %vm197_vm2, %v402_v0  ;;  %2405 = vmatmul.mubr.msk.f32.vlgmr.msra.gmra.mxu0 %vm197_vm2, %v402_v0 }
 0x577   :  { %2419 = vmatpush3.msra.mxu0 %v2828_v4  ;;  %2426 = vmatprep.mubr.msk.f32.mxu0 %vm2749_vm1, %v2748_v3 }
 0x578   :  { %2420 = vmatprep.subr.mxu0 %v2748_v3 }
 0x579   :  { %2421 = vmatpush3.msra.mxu0 %v2839_v6 }
 0x57a   :  { %2422 = vmatprep.subr.mxu0 %v2748_v3 }
 0x57b   :  { %2423 = vmatpush3.msra.mxu0 %v2853_v9 }
 0x57c   :  { %2424 = vmatprep.subr.mxu0 %v2748_v3 }
 0x57d   :  { %2425 = vmatpush3.msra.mxu0 %v2863_v10 }
 0x57e   :  { %2440 = vmatprep.subr.mxu0 %v2748_v3 }
 0x636   :  { %v476_v1 = vpop.f32.mrf.mxu0 }
 0x637   :  { %v480_v2 = vadd.f32 %v476_v1, %v2905_v21 }
 0x638   :  { %v2406_v5 = vpop.f32.mrf.mxu0 }
 0x639   :  { %2636 = vtanh.f32 %v480_v2  ;;  %v2199_v8 = vmul.f32 -1.442695, %v480_v2 }
 0x63b   :  { %2638 = vpow2.f32 %v2199_v8 }
 0x646   :  { %v2637_v7 = vpop.eup %2636 }
 0x647   :  { %490 = vrot.lane.b32.xlu0 %v2637_v7, %s2750_s3 }
 0x648   :  { %v2639_v11 = vpop.eup %2638 }
 0x649   :  { %v484_v12 = vadd.f32 1.0, %v2639_v11 }
 0x64b   :  { %2640 = vrcp.f32 %v484_v12 }
 0x658   :  { %v2641_v13 = vpop.eup %2640 }
 0x659   :  { %v488_v16 = vmul.f32 %v2641_v13, %v393_v60 }
 0x6b9   :  { %v491_v14 = vpop.permute.xlu0 %490 }
 0x6ba   :  { %v493_v15 = vmul.f32 %v2641_v13, %v491_v14  ;;  %v1038_v14 = vld [vmem:[%s3306_s4 + $0x10] sm:$0xff] }
 0x6bc   :  { %495 = vrot.lane.b32.xlu1 %v493_v15, %s2751_s23  ;;  %v1045_v15 = vld [vmem:[#allocation2] sm:$0xff] }
 0x72e   :  { %v496_v17 = vpop.permute.xlu1 %495 }
 0x72f   :  { %v498_v18 = vadd.f32 %v496_v17, %v488_v16  ;;  %v1037_v16 = vld [vmem:[%s3306_s4 + $0x8] sm:$0xff]  ;;  %v1036_v17 = vld [vmem:[%s3306_s4] sm:$0xff] }
 0x731   :  { %2642 = vtanh.f32 %v498_v18 }
 0x73e   :  { %v2643_v20 = vpop.eup %2642 }
 0x73f   :  { %501 = vrot.lane.b32.xlu0 %v2643_v20, %s2750_s3 }
 0x7b1   :  { %v502_v21 = vpop.permute.xlu0 %501 }
 0x7b2   :  { %v504_v22 = vmul.f32 %v2641_v13, %v502_v21 }
 0x7b4   :  { %506 = vrot.lane.b32.xlu1 %v504_v22, %s2751_s23 }
 0x826   :  { %v507_v24 = vpop.permute.xlu1 %506 }
 0x827   :  { %510 = vst.msk [vmem:[#allocation2 + $0x10] sm:$0xff] %vm197_vm2, %v507_v24  ;;  %2416 = vmatmul.mubr.msk.f32.vlgmr.msra.gmra.mxu1 %vm197_vm2, %v507_v24 }
 0x828   :  { %2430 = vmatpush3.msra.mxu1 %v2828_v4  ;;  %2437 = vmatprep.mubr.msk.f32.mxu1 %vm2749_vm1, %v2748_v3 }
 0x829   :  { %2431 = vmatprep.subr.mxu1 %v2748_v3 }
 0x82a   :  { %2432 = vmatpush3.msra.mxu1 %v2839_v6 }
 0x82b   :  { %2433 = vmatprep.subr.mxu1 %v2748_v3 }
 0x82c   :  { %2434 = vmatpush3.msra.mxu1 %v2853_v9 }
 0x82d   :  { %2435 = vmatprep.subr.mxu1 %v2748_v3 }
 0x82e   :  { %2436 = vmatpush3.msra.mxu1 %v2863_v10  ;;  %v1047_v20 = vld [vmem:[#allocation2 + $0x10] sm:$0xff] }
 0x82f   :  { %2451 = vmatprep.subr.mxu1 %v2748_v3 }
 0x8e7   :  { %v581_v26 = vpop.f32.mrf.mxu1 }
 0x8e8   :  { %v585_v28 = vadd.f32 %v581_v26, %v2903_v19 }
 0x8e9   :  { %v2417_v29 = vpop.f32.mrf.mxu1 }
 0x8ea   :  { %2644 = vtanh.f32 %v585_v28  ;;  %v2201_v32 = vmul.f32 -1.442695, %v585_v28 }
 0x8ec   :  { %2646 = vpow2.f32 %v2201_v32 }
 0x8f7   :  { %v2645_v31 = vpop.eup %2644 }
 0x8f8   :  { %595 = vrot.lane.b32.xlu0 %v2645_v31, %s2750_s3 }
 0x8f9   :  { %v2647_v33 = vpop.eup %2646 }
 0x8fa   :  { %v589_v34 = vadd.f32 1.0, %v2647_v33 }
 0x8fc   :  { %2648 = vrcp.f32 %v589_v34 }
 0x909   :  { %v2649_v35 = vpop.eup %2648 }
 0x90a   :  { %v593_v38 = vmul.f32 %v2649_v35, %v498_v18  ;;  %v1046_v18 = vld [vmem:[#allocation2 + $0x8] sm:$0xff] }
 0x96a   :  { %v596_v36 = vpop.permute.xlu0 %595 }
 0x96b   :  { %v598_v37 = vmul.f32 %v2649_v35, %v596_v36 }
 0x96d   :  { %600 = vrot.lane.b32.xlu1 %v598_v37, %s2751_s23 }
 0x9df   :  { %v601_v39 = vpop.permute.xlu1 %600 }
 0x9e0   :  { %v603_v40 = vadd.f32 %v601_v39, %v593_v38 }
 0x9e2   :  { %2650 = vtanh.f32 %v603_v40 }
 0x9ef   :  { %v2651_v19 = vpop.eup %2650 }
 0x9f0   :  { %606 = vrot.lane.b32.xlu0 %v2651_v19, %s2750_s3  ;;  %v3033_v19 = vld [vmem:[%s3307_s5 + $0x18] sm:$0xff] }
 0xa62   :  { %v607_v41 = vpop.permute.xlu0 %606 }
 0xa63   :  { %v609_v42 = vmul.f32 %v2649_v35, %v607_v41  ;;  %v3039_v41 = vld [vmem:[%s3307_s5 + $0x10] sm:$0xff] }
 0xa65   :  { %611 = vrot.lane.b32.xlu1 %v609_v42, %s2751_s23  ;;  %v3046_v42 = vld [vmem:[%s3307_s5 + $0x8] sm:$0xff] }
 0xad7   :  { %v612_v43 = vpop.permute.xlu1 %611 }
 0xad8   :  { %615 = vst.msk [vmem:[#allocation2 + $0x18] sm:$0xff] %vm197_vm2, %v612_v43  ;;  %2427 = vmatmul.mubr.msk.f32.vlgmr.msra.gmra.mxu0 %vm197_vm2, %v612_v43  ;;  %v3053_v43 = vld [vmem:[%s3307_s5] sm:$0xff] }
 0xad9   :  { %2441 = vmatpush3.msra.mxu0 %v2828_v4  ;;  %2448 = vmatprep.mubr.msk.f32.mxu0 %vm2749_vm1, %v2748_v3 }
 0xada   :  { %2442 = vmatprep.subr.mxu0 %v2748_v3 }
 0xadb   :  { %2443 = vmatpush3.msra.mxu0 %v2839_v6 }
 0xadc   :  { %2444 = vmatprep.subr.mxu0 %v2748_v3 }
 0xadd   :  { %2445 = vmatpush3.msra.mxu0 %v2853_v9 }
 0xade   :  { %2446 = vmatprep.subr.mxu0 %v2748_v3 }
 0xadf   :  { %2447 = vmatpush3.msra.mxu0 %v2863_v10  ;;  %v1048_v21 = vld [vmem:[#allocation2 + $0x18] sm:$0xff] }
 0xb98   :  { %v686_v44 = vpop.f32.mrf.mxu0 }
 0xb99   :  { %v690_v45 = vadd.f32 %v686_v44, %v2909_v25 }
 0xb9a   :  { %v2428_v46 = vpop.f32.mrf.mxu0 }
 0xb9b   :  { %2652 = vtanh.f32 %v690_v45  ;;  %v2203_v48 = vmul.f32 -1.442695, %v690_v45 }
 0xb9d   :  { %2654 = vpow2.f32 %v2203_v48 }
 0xba8   :  { %v2653_v47 = vpop.eup %2652 }
 0xba9   :  { %700 = vrot.lane.b32.xlu0 %v2653_v47, %s2750_s3 }
 0xbaa   :  { %v2655_v49 = vpop.eup %2654 }
 0xbab   :  { %v694_v50 = vadd.f32 1.0, %v2655_v49 }
 0xbad   :  { %2656 = vrcp.f32 %v694_v50 }
 0xbba   :  { %v2657_v51 = vpop.eup %2656 }
 0xbbb   :  { %v698_v54 = vmul.f32 %v2657_v51, %v603_v40 }
 0xc1b   :  { %v701_v52 = vpop.permute.xlu0 %700 }
 0xc1c   :  { %v703_v53 = vmul.f32 %v2657_v51, %v701_v52 }
 0xc1e   :  { %705 = vrot.lane.b32.xlu1 %v703_v53, %s2751_s23  ;;  %v3089_v53 = vld [vmem:[%s3308_s6] ss:$0 sm:$0xff] }
 0xc90   :  { %v706_v55 = vpop.permute.xlu1 %705 }
 0xc91   :  { %v708_v56 = vadd.f32 %v706_v55, %v698_v54 }
 0xc93   :  { %2658 = vtanh.f32 %v708_v56 }
 0xca0   :  { %v2659_v25 = vpop.eup %2658 }
 0xca1   :  { %711 = vrot.lane.b32.xlu0 %v2659_v25, %s2750_s3 }
 0xd13   :  { %v712_v57 = vpop.permute.xlu0 %711 }
 0xd14   :  { %v714_v58 = vmul.f32 %v2657_v51, %v712_v57 }
 0xd16   :  { %716 = vrot.lane.b32.xlu1 %v714_v58, %s2751_s23 }
 0xd88   :  { %v717_v59 = vpop.permute.xlu1 %716 }
 0xd89   :  { %720 = vst.msk [vmem:[#allocation2 + $0x20] sm:$0xff] %vm197_vm2, %v717_v59  ;;  %2438 = vmatmul.mubr.msk.f32.vlgmr.msra.gmra.mxu1 %vm197_vm2, %v717_v59 }
 0xd8a   :  { %2452 = vmatpush3.msra.mxu1 %v2828_v4  ;;  %2459 = vmatprep.mubr.msk.f32.mxu1 %vm2749_vm1, %v2748_v3 }
 0xd8b   :  { %2453 = vmatprep.subr.mxu1 %v2748_v3 }
 0xd8c   :  { %2454 = vmatpush3.msra.mxu1 %v2839_v6 }
 0xd8d   :  { %2455 = vmatprep.subr.mxu1 %v2748_v3 }
 0xd8e   :  { %2456 = vmatpush3.msra.mxu1 %v2853_v9 }
 0xd8f   :  { %2457 = vmatprep.subr.mxu1 %v2748_v3 }
 0xd90   :  { %2458 = vmatpush3.msra.mxu1 %v2863_v10  ;;  %v1049_v22 = vld [vmem:[#allocation2 + $0x20] sm:$0xff] }
 0xd91   :  { %2482 = vmatprep.subr.mxu1 %v2748_v3 }
 0xe49   :  { %v791_v60 = vpop.f32.mrf.mxu1 }
 0xe4a   :  { %v795_v4 = vadd.f32 %v791_v60, %v2907_v23  ;;  %v1039_v23 = vld [vmem:[%s3306_s4 + $0x18] sm:$0xff] }
 0xe4b   :  { %v2439_v61 = vpop.f32.mrf.mxu1  ;;  %2462 = vmatprep.subr.mxu0 %v1039_v23 }
 0xe4c   :  { %2660 = vtanh.f32 %v795_v4  ;;  %v2205_v63 = vmul.f32 -1.442695, %v795_v4 }
 0xe4e   :  { %2662 = vpow2.f32 %v2205_v63 }
 0xe59   :  { %v2661_v62 = vpop.eup %2660 }
 0xe5a   :  { %805 = vrot.lane.b32.xlu0 %v2661_v62, %s2750_s3 }
 0xe5b   :  { %v2663_v6 = vpop.eup %2662 }
 0xe5c   :  { %v799_v0 = vadd.f32 1.0, %v2663_v6 }
 0xe5e   :  { %2664 = vrcp.f32 %v799_v0 }
 0xe6b   :  { %v2665_v9 = vpop.eup %2664 }
 0xe6c   :  { %v803_v10 = vmul.f32 %v2665_v9, %v708_v56 }
 0xecc   :  { %v806_v1 = vpop.permute.xlu0 %805 }
 0xecd   :  { %v808_v2 = vmul.f32 %v2665_v9, %v806_v1 }
 0xecf   :  { %810 = vrot.lane.b32.xlu1 %v808_v2, %s2751_s23 }
 0xf41   :  { %v811_v5 = vpop.permute.xlu1 %810 }
 0xf42   :  { %v813_v7 = vadd.f32 %v811_v5, %v803_v10 }
 0xf44   :  { %2666 = vtanh.f32 %v813_v7 }
 0xf51   :  { %v2667_v8 = vpop.eup %2666 }
 0xf52   :  { %816 = vrot.lane.b32.xlu0 %v2667_v8, %s2750_s3 }
 0xfc4   :  { %v817_v11 = vpop.permute.xlu0 %816 }
 0xfc5   :  { %v819_v12 = vmul.f32 %v2665_v9, %v817_v11 }
 0xfc7   :  { %821 = vrot.lane.b32.xlu1 %v819_v12, %s2751_s23 }
0x1039   :  { %v822_v13 = vpop.permute.xlu1 %821 }
0x103a   :  { %825 = vst.msk [vmem:[#allocation2 + $0x28] sm:$0xff] %vm197_vm2, %v822_v13  ;;  %2449 = vmatmul.mubr.msk.f32.vlgmr.msra.gmra.mxu0 %vm197_vm2, %v822_v13 }
0x103b   :  { %2463 = vmatpush3.msra.mxu0 %v1039_v23  ;;  %2470 = vmatprep.mubr.msk.f32.mxu0 %vm197_vm2, %v1045_v15 }
0x103c   :  { %2464 = vmatprep.subr.mxu0 %v1038_v14 }
0x103d   :  { %2465 = vmatpush3.msra.mxu0 %v1038_v14 }
0x103e   :  { %2466 = vmatprep.subr.mxu0 %v1037_v16 }
0x103f   :  { %2467 = vmatpush3.msra.mxu0 %v1037_v16 }
0x1040   :  { %2468 = vmatprep.subr.mxu0 %v1036_v17 }
0x1041   :  { %2469 = vmatpush3.msra.mxu0 %v1036_v17  ;;  %v1050_v24 = vld [vmem:[#allocation2 + $0x28] sm:$0xff] }
0x1042   :  { %2471 = vmatmul.mubr.msk.f32.vlgmr.msra.gmra.mxu0 %vm197_vm2, %v1046_v18  ;;  %2504 = vmatprep.subr.mxu0 %v2748_v3 }
0x1043   :  { %2473 = vmatprep.mubr.msk.f32.mxu0 %vm197_vm2, %v1047_v20  ;;  %2505 = vmatpush3.msra.mxu0 %v3033_v19 }
0x1044   :  { %2506 = vmatprep.subr.mxu0 %v2748_v3 }
0x1045   :  { %2507 = vmatpush3.msra.mxu0 %v3039_v41 }
0x1046   :  { %2474 = vmatmul.mubr.msk.f32.gmra.mxu0 %vm197_vm2, %v1048_v21  ;;  %2508 = vmatprep.subr.mxu0 %v2748_v3 }
0x1047   :  { %2476 = vmatprep.mubr.msk.f32.mxu0 %vm197_vm2, %v1049_v22  ;;  %2509 = vmatpush3.msra.mxu0 %v3046_v42 }
0x1048   :  { %2510 = vmatprep.subr.mxu0 %v2748_v3 }
0x1049   :  { %2511 = vmatpush3.msra.mxu0 %v3053_v43 }
0x104a   :  { %2477 = vmatmul.mubr.msk.f32.gmra.mxu0 %vm197_vm2, %v1050_v24  ;;  %2526 = vmatprep.subr.mxu0 %v2748_v3 }
0x10fa   :  { %v896_v26 = vpop.f32.mrf.mxu0 }
0x10fb   :  { %v900_v28 = vadd.f32 %v896_v26, %v2913_v30 }
0x10fc   :  { %v2450_v29 = vpop.f32.mrf.mxu0 }
0x10fd   :  { %2668 = vtanh.f32 %v900_v28  ;;  %v2207_v32 = vmul.f32 -1.442695, %v900_v28 }
0x10ff   :  { %2670 = vpow2.f32 %v2207_v32 }
0x1102   :  { %v3083_v48 = vpop.f32.mrf.mxu0 }
0x1103   :  { %v1155_v20 = vadd.f32 %v3083_v48, %v3089_v53 }
0x1104   :  { %v1149_v52 = vpop.f32.mrf.mxu0 }
0x1105   :  { %v1150_v54 = vadd.f32 %v3089_v53, %v1149_v52 }
0x110a   :  { %v2669_v31 = vpop.eup %2668 }
0x110b   :  { %910 = vrot.lane.b32.xlu0 %v2669_v31, %s2750_s3 }
0x110c   :  { %v2671_v33 = vpop.eup %2670 }
0x110d   :  { %v904_v34 = vadd.f32 1.0, %v2671_v33 }
0x110f   :  { %2672 = vrcp.f32 %v904_v34 }
0x111c   :  { %v2673_v35 = vpop.eup %2672 }
0x111d   :  { %v908_v38 = vmul.f32 %v2673_v35, %v813_v7 }
0x117d   :  { %v911_v36 = vpop.permute.xlu0 %910 }
0x117e   :  { %v913_v37 = vmul.f32 %v2673_v35, %v911_v36 }
0x1180   :  { %915 = vrot.lane.b32.xlu1 %v913_v37, %s2751_s23 }
0x11f2   :  { %v916_v39 = vpop.permute.xlu1 %915 }
0x11f3   :  { %v3026_v40 = vadd.f32 %v916_v39, %v908_v38 }
0x11f5   :  { %2674 = vtanh.f32 %v3026_v40 }
0x1202   :  { %v2675_v30 = vpop.eup %2674 }
0x1203   :  { %921 = vrot.lane.b32.xlu0 %v2675_v30, %s2750_s3 }
0x1275   :  { %v922_v44 = vpop.permute.xlu0 %921 }
0x1276   :  { %v924_v45 = vmul.f32 %v2673_v35, %v922_v44 }
0x1278   :  { %926 = vrot.lane.b32.xlu1 %v924_v45, %s2751_s23 }
0x12ea   :  { %v927_v46 = vpop.permute.xlu1 %926 }
0x12eb   :  { %930 = vst.msk [vmem:[#allocation2 + $0x30] sm:$0xff] %vm197_vm2, %v927_v46  ;;  %2460 = vmatmul.mubr.msk.f32.vlgmr.msra.gmra.mxu1 %vm197_vm2, %v927_v46  ;;  %v2475_v46 = vpop.f32.mrf.mxu0 }
0x12ec   :  { %2483 = vmatpush3.msra.mxu1 %v3033_v19  ;;  %2490 = vmatprep.mubr.msk.f32.mxu1 %vm2749_vm1, %v2748_v3 }
0x12ed   :  { %2484 = vmatprep.subr.mxu1 %v2748_v3 }
0x12ee   :  { %2485 = vmatpush3.msra.mxu1 %v3039_v41 }
0x12ef   :  { %2486 = vmatprep.subr.mxu1 %v2748_v3 }
0x12f0   :  { %2487 = vmatpush3.msra.mxu1 %v3046_v42 }
0x12f1   :  { %2488 = vmatprep.subr.mxu1 %v2748_v3 }
0x12f2   :  { %2489 = vmatpush3.msra.mxu1 %v3053_v43  ;;  %v1051_v47 = vld [vmem:[#allocation2 + $0x30] sm:$0xff] }
0x12f3   :  { %2491 = vmatmul.mubr.f32.vlgmr.msra.gmra.mxu1 %v2748_v3  ;;  %2479 = vmatprep.mubr.msk.f32.mxu0 %vm197_vm2, %v1051_v47  ;;  %v1159_v47 = vpop.f32.mrf.mxu0 }
0x12f4   :  { %2493 = vmatprep.subr.mxu1 %v2748_v3  ;;  %2501 = vmatprep.mubr.msk.f32.mxu1 %vm2749_vm1, %v2748_v3  ;;  %v1160_v52 = vadd.f32 %v3089_v53, %v1159_v47 }
0x12f5   :  { %2494 = vmatpush3.msra.mxu1 %v3033_v19  ;;  %v3133_v48 = vpop.f32.mrf.mxu0 }
0x12f6   :  { %2495 = vmatprep.subr.mxu1 %v2748_v3 }
0x12f7   :  { %2496 = vmatpush3.msra.mxu1 %v3039_v41 }
0x12f8   :  { %2497 = vmatprep.subr.mxu1 %v2748_v3 }
0x12f9   :  { %2498 = vmatpush3.msra.mxu1 %v3046_v42 }
0x12fa   :  { %2499 = vmatprep.subr.mxu1 %v2748_v3 }
0x12fb   :  { %2500 = vmatpush3.msra.mxu1 %v3053_v43 }
0x12fc   :  { %2515 = vmatprep.subr.mxu1 %v2748_v3 }
0x13ab   :  { %v1001_v49 = vpop.f32.mrf.mxu1 }
0x13ac   :  { %v1005_v50 = vadd.f32 %v1001_v49, %v2911_v27  ;;  %v3135_v49 = vpop.f32.mrf.mxu0 }
0x13ad   :  { %v2461_v51 = vpop.f32.mrf.mxu1 }
0x13ae   :  { %v2209_v1 = vmul.f32 -1.442695, %v1005_v50 }
0x13b3   :  { %v1263_v55 = vpop.f32.mrf.mxu1 }
0x13b4   :  { %v1267_v56 = vadd.f32 %v1263_v55, %v1150_v54 }
0x13b5   :  { %v2492_v25 = vpop.f32.mrf.mxu1 }
0x13b6   :  { %2676 = vtanh.f32 %v1267_v56  ;;  %v2219_v58 = vmul.f32 -1.442695, %v1267_v56 }
0x13b8   :  { %2678 = vpow2.f32 %v2219_v58 }
0x13c3   :  { %v2677_v57 = vpop.eup %2676 }
0x13c4   :  { %1277 = vrot.lane.b32.xlu0 %v2677_v57, %s2750_s3 }
0x13c5   :  { %v2679_v59 = vpop.eup %2678 }
0x13c6   :  { %v1271_v27 = vadd.f32 1.0, %v2679_v59 }
0x13c8   :  { %2680 = vrcp.f32 %v1271_v27 }
0x13d5   :  { %v2681_v60 = vpop.eup %2680 }
0x13d6   :  { %v1275_v62 = vmul.f32 0.0, %v2681_v60 }
0x1436   :  { %v1278_v4 = vpop.permute.xlu0 %1277 }
0x1437   :  { %v1280_v61 = vmul.f32 %v2681_v60, %v1278_v4 }
0x1439   :  { %1282 = vrot.lane.b32.xlu1 %v1280_v61, %s2751_s23 }
0x14ab   :  { %v1283_v63 = vpop.permute.xlu1 %1282 }
0x14ac   :  { %v1285_v6 = vadd.f32 %v1283_v63, %v1275_v62 }
0x14ae   :  { %2682 = vtanh.f32 %v1285_v6 }
0x14af   :  { %2684 = vtanh.f32 %v1005_v50 }
0x14b0   :  { %2686 = vpow2.f32 %v2209_v1 }
0x14bb   :  { %v2683_v0 = vpop.eup %2682 }
0x14bc   :  { %1288 = vrot.lane.b32.xlu0 %v2683_v0, %s2750_s3  ;;  %v2685_v9 = vpop.eup %2684 }
0x14bd   :  { %v2687_v2 = vpop.eup %2686 }
0x14be   :  { %v1009_v10 = vadd.f32 1.0, %v2687_v2  ;;  %v1165_v2 = vadd.f32 %v2475_v46, %v3089_v53 }
0x14c0   :  { %1015 = vrot.lane.b32.xlu0 %v2685_v9, %s2750_s3  ;;  %2688 = vrcp.f32 %v1009_v10 }
0x14cd   :  { %v2689_v23 = vpop.eup %2688 }
0x14ce   :  { %v1013_v13 = vmul.f32 %v2689_v23, %v3026_v40 }
0x152e   :  { %v1289_v5 = vpop.permute.xlu0 %1288 }
0x152f   :  { %v1291_v7 = vmul.f32 %v2681_v60, %v1289_v5 }
0x1531   :  { %1294 = vrot.lane.b32.xlu1 %v1291_v7, %s2751_s23 }
0x1532   :  { %v1016_v8 = vpop.permute.xlu0 %1015 }
0x1533   :  { %v1018_v11 = vmul.f32 %v2689_v23, %v1016_v8 }
0x1535   :  { %1020 = vrot.lane.b32.xlu0 %v1018_v11, %s2751_s23 }
0x15a3   :  { %v1295_v12 = vpop.permute.xlu1 %1294 }
0x15a4   :  { %2502 = vmatmul.mubr.msk.f32.vlgmr.msra.gmra.mxu1 %vm197_vm2, %v1295_v12 }
0x15a5   :  { %2516 = vmatpush3.msra.mxu1 %v3033_v19  ;;  %2523 = vmatprep.mubr.msk.f32.mxu1 %vm2749_vm1, %v2748_v3 }
0x15a6   :  { %2517 = vmatprep.subr.mxu1 %v2748_v3 }
0x15a7   :  { %v1021_v14 = vpop.permute.xlu0 %1020  ;;  %2518 = vmatpush3.msra.mxu1 %v3039_v41 }
0x15a8   :  { %v1023_v15 = vadd.f32 %v1021_v14, %v1013_v13  ;;  %2519 = vmatprep.subr.mxu1 %v2748_v3 }
0x15a9   :  { %2520 = vmatpush3.msra.mxu1 %v3046_v42 }
0x15aa   :  { %2690 = vtanh.f32 %v1023_v15  ;;  %2521 = vmatprep.subr.mxu1 %v2748_v3 }
0x15ab   :  { %2522 = vmatpush3.msra.mxu1 %v3053_v43 }
0x15ac   :  { %2537 = vmatprep.subr.mxu1 %v2748_v3 }
0x15b7   :  { %v2691_v16 = vpop.eup %2690 }
0x15b8   :  { %1026 = vrot.lane.b32.xlu0 %v2691_v16, %s2750_s3 }
0x162a   :  { %v1027_v17 = vpop.permute.xlu0 %1026 }
0x162b   :  { %v1029_v18 = vmul.f32 %v2689_v23, %v1027_v17 }
0x162d   :  { %1031 = vrot.lane.b32.xlu0 %v1029_v18, %s2751_s23 }
0x1664   :  { %v1364_v21 = vpop.f32.mrf.mxu1 }
0x1665   :  { %v1368_v22 = vadd.f32 %v1364_v21, %v1155_v20 }
0x1666   :  { %v2503_v24 = vpop.f32.mrf.mxu1 }
0x1667   :  { %2692 = vtanh.f32 %v1368_v22  ;;  %v2221_v31 = vmul.f32 -1.442695, %v1368_v22 }
0x1669   :  { %2694 = vpow2.f32 %v2221_v31 }
0x1674   :  { %v2693_v26 = vpop.eup %2692 }
0x1675   :  { %1378 = vrot.lane.b32.xlu1 %v2693_v26, %s2750_s3  ;;  %v1170_v26 = vadd.f32 %v3089_v53, %v3135_v49 }
0x1676   :  { %v2695_v32 = vpop.eup %2694 }
0x1677   :  { %v1372_v33 = vadd.f32 1.0, %v2695_v32 }
0x1679   :  { %2696 = vrcp.f32 %v1372_v33 }
0x1686   :  { %v2697_v34 = vpop.eup %2696 }
0x1687   :  { %v1376_v37 = vmul.f32 %v2697_v34, %v1285_v6 }
0x169f   :  { %v1032_v28 = vpop.permute.xlu0 %1031 }
0x16a0   :  { %1035 = vst.msk [vmem:[#allocation2 + $0x38] sm:$0xff] %vm197_vm2, %v1032_v28 }
0x16a7   :  { %v1052_v29 = vld [vmem:[#allocation2 + $0x38] sm:$0xff] }
0x16a8   :  { %2480 = vmatmul.mubr.msk.f32.gmra.mxu0 %vm197_vm2, %v1052_v29 }
0x16a9   :  { %2512 = vmatprep.mubr.msk.f32.mxu0 %vm2749_vm1, %v2748_v3 }
0x16e7   :  { %v1379_v35 = vpop.permute.xlu1 %1378 }
0x16e8   :  { %v1381_v36 = vmul.f32 %v2697_v34, %v1379_v35 }
0x16ea   :  { %1383 = vrot.lane.b32.xlu1 %v1381_v36, %s2751_s23 }
0x175c   :  { %v1384_v38 = vpop.permute.xlu1 %1383 }
0x175d   :  { %v1386_v39 = vadd.f32 %v1384_v38, %v1376_v37 }
0x175f   :  { %2698 = vtanh.f32 %v1386_v39 }
0x1768   :  { %v3137_v50 = vpop.f32.mrf.mxu0 }
0x176a   :  { %v3139_v51 = vpop.f32.mrf.mxu0 }
0x176c   :  { %v2699_v40 = vpop.eup %2698 }
0x176d   :  { %1389 = vrot.lane.b32.xlu1 %v2699_v40, %s2750_s3 }
0x17df   :  { %v1390_v30 = vpop.permute.xlu1 %1389 }
0x17e0   :  { %v1392_v44 = vmul.f32 %v2697_v34, %v1390_v30 }
0x17e2   :  { %1395 = vrot.lane.b32.xlu1 %v1392_v44, %s2751_s23 }
0x1854   :  { %v1396_v45 = vpop.permute.xlu1 %1395 }
0x1855   :  { %2513 = vmatmul.mubr.msk.f32.vlgmr.msra.gmra.mxu0 %vm197_vm2, %v1396_v45 }
0x1856   :  { %2527 = vmatpush3.msra.mxu0 %v3033_v19  ;;  %2534 = vmatprep.mubr.msk.f32.mxu0 %vm2749_vm1, %v2748_v3 }
0x1857   :  { %2528 = vmatprep.subr.mxu0 %v2748_v3 }
0x1858   :  { %2529 = vmatpush3.msra.mxu0 %v3039_v41 }
0x1859   :  { %2530 = vmatprep.subr.mxu0 %v2748_v3 }
0x185a   :  { %2531 = vmatpush3.msra.mxu0 %v3046_v42 }
0x185b   :  { %2532 = vmatprep.subr.mxu0 %v2748_v3 }
0x185c   :  { %2533 = vmatpush3.msra.mxu0 %v3053_v43 }
0x185d   :  { %2548 = vmatprep.subr.mxu0 %v2748_v3 }
0x1915   :  { %v1465_v54 = vpop.f32.mrf.mxu0 }
0x1916   :  { %v1469_v55 = vadd.f32 %v1465_v54, %v1160_v52 }
0x1917   :  { %v2514_v56 = vpop.f32.mrf.mxu0 }
0x1918   :  { %2700 = vtanh.f32 %v1469_v55  ;;  %v2223_v57 = vmul.f32 -1.442695, %v1469_v55 }
0x191a   :  { %2702 = vpow2.f32 %v2223_v57 }
0x1925   :  { %v2701_v25 = vpop.eup %2700 }
0x1926   :  { %1479 = vrot.lane.b32.xlu0 %v2701_v25, %s2750_s3 }
0x1927   :  { %v2703_v58 = vpop.eup %2702 }
0x1928   :  { %v1473_v59 = vadd.f32 1.0, %v2703_v58 }
0x192a   :  { %2704 = vrcp.f32 %v1473_v59 }
0x1937   :  { %v2705_v27 = vpop.eup %2704 }
0x1938   :  { %v1477_v61 = vmul.f32 %v2705_v27, %v1386_v39 }
0x1998   :  { %v1480_v60 = vpop.permute.xlu0 %1479 }
0x1999   :  { %v1482_v4 = vmul.f32 %v2705_v27, %v1480_v60 }
0x199b   :  { %1484 = vrot.lane.b32.xlu1 %v1482_v4, %s2751_s23 }
0x1a0d   :  { %v1485_v62 = vpop.permute.xlu1 %1484 }
0x1a0e   :  { %v1487_v63 = vadd.f32 %v1485_v62, %v1477_v61  ;;  %v1180_v62 = vadd.f32 %v3089_v53, %v3139_v51 }
0x1a10   :  { %2706 = vtanh.f32 %v1487_v63 }
0x1a1d   :  { %v2707_v6 = vpop.eup %2706 }
0x1a1e   :  { %1490 = vrot.lane.b32.xlu0 %v2707_v6, %s2750_s3 }
0x1a90   :  { %v1491_v0 = vpop.permute.xlu0 %1490 }
0x1a91   :  { %v1493_v9 = vmul.f32 %v2705_v27, %v1491_v0 }
0x1a93   :  { %1496 = vrot.lane.b32.xlu1 %v1493_v9, %s2751_s23 }
0x1b05   :  { %v1497_v1 = vpop.permute.xlu1 %1496 }
0x1b06   :  { %2524 = vmatmul.mubr.msk.f32.vlgmr.msra.gmra.mxu1 %vm197_vm2, %v1497_v1 }
0x1b07   :  { %2538 = vmatpush3.msra.mxu1 %v3033_v19  ;;  %2545 = vmatprep.mubr.msk.f32.mxu1 %vm2749_vm1, %v2748_v3 }
0x1b08   :  { %2539 = vmatprep.subr.mxu1 %v2748_v3 }
0x1b09   :  { %2540 = vmatpush3.msra.mxu1 %v3039_v41 }
0x1b0a   :  { %2541 = vmatprep.subr.mxu1 %v2748_v3 }
0x1b0b   :  { %2542 = vmatpush3.msra.mxu1 %v3046_v42 }
0x1b0c   :  { %2543 = vmatprep.subr.mxu1 %v2748_v3 }
0x1b0d   :  { %2544 = vmatpush3.msra.mxu1 %v3053_v43 }
0x1b0e   :  { %2559 = vmatprep.subr.mxu1 %v2748_v3 }
0x1bc6   :  { %v1566_v10 = vpop.f32.mrf.mxu1 }
0x1bc7   :  { %v1570_v5 = vadd.f32 %v1566_v10, %v1165_v2 }
0x1bc8   :  { %v2525_v7 = vpop.f32.mrf.mxu1 }
0x1bc9   :  { %2708 = vtanh.f32 %v1570_v5  ;;  %v2225_v8 = vmul.f32 -1.442695, %v1570_v5 }
0x1bcb   :  { %2710 = vpow2.f32 %v2225_v8 }
0x1bd6   :  { %v2709_v23 = vpop.eup %2708 }
0x1bd7   :  { %1580 = vrot.lane.b32.xlu0 %v2709_v23, %s2750_s3 }
0x1bd8   :  { %v2711_v11 = vpop.eup %2710 }
0x1bd9   :  { %v1574_v12 = vadd.f32 1.0, %v2711_v11 }
0x1bdb   :  { %2712 = vrcp.f32 %v1574_v12 }
0x1be8   :  { %v2713_v13 = vpop.eup %2712 }
0x1be9   :  { %v1578_v16 = vmul.f32 %v2713_v13, %v1487_v63 }
0x1c49   :  { %v1581_v14 = vpop.permute.xlu0 %1580 }
0x1c4a   :  { %v1583_v15 = vmul.f32 %v2713_v13, %v1581_v14 }
0x1c4c   :  { %1585 = vrot.lane.b32.xlu1 %v1583_v15, %s2751_s23 }
0x1cbe   :  { %v1586_v17 = vpop.permute.xlu1 %1585 }
0x1cbf   :  { %v1588_v18 = vadd.f32 %v1586_v17, %v1578_v16  ;;  %v1185_v16 = vadd.f32 %v3137_v50, %v3089_v53  ;;  %v2003_v50 = vld [vmem:[%s3309_s7 + $0x18] sm:$0xff] }
0x1cc1   :  { %2714 = vtanh.f32 %v1588_v18 }
0x1cce   :  { %v2715_v20 = vpop.eup %2714 }
0x1ccf   :  { %1591 = vrot.lane.b32.xlu0 %v2715_v20, %s2750_s3 }
0x1d41   :  { %v1592_v21 = vpop.permute.xlu0 %1591 }
0x1d42   :  { %v1594_v22 = vmul.f32 %v2713_v13, %v1592_v21 }
0x1d44   :  { %1597 = vrot.lane.b32.xlu1 %v1594_v22, %s2751_s23 }
0x1db6   :  { %v1598_v24 = vpop.permute.xlu1 %1597 }
0x1db7   :  { %2535 = vmatmul.mubr.msk.f32.vlgmr.msra.gmra.mxu0 %vm197_vm2, %v1598_v24 }
0x1db8   :  { %2549 = vmatpush3.msra.mxu0 %v3033_v19  ;;  %2556 = vmatprep.mubr.msk.f32.mxu0 %vm2749_vm1, %v2748_v3 }
0x1db9   :  { %2550 = vmatprep.subr.mxu0 %v2748_v3 }
0x1dba   :  { %2551 = vmatpush3.msra.mxu0 %v3039_v41 }
0x1dbb   :  { %2552 = vmatprep.subr.mxu0 %v2748_v3 }
0x1dbc   :  { %2553 = vmatpush3.msra.mxu0 %v3046_v42 }
0x1dbd   :  { %2554 = vmatprep.subr.mxu0 %v2748_v3 }
0x1dbe   :  { %2555 = vmatpush3.msra.mxu0 %v3053_v43 }
0x1dbf   :  { %2570 = vmatprep.subr.mxu0 %v2748_v3 }
0x1e77   :  { %v1667_v28 = vpop.f32.mrf.mxu0 }
0x1e78   :  { %v1671_v29 = vadd.f32 %v1667_v28, %v1170_v26 }
0x1e79   :  { %v2536_v31 = vpop.f32.mrf.mxu0 }
0x1e7a   :  { %2716 = vtanh.f32 %v1671_v29  ;;  %v2227_v33 = vmul.f32 -1.442695, %v1671_v29 }
0x1e7c   :  { %2718 = vpow2.f32 %v2227_v33 }
0x1e87   :  { %v2717_v32 = vpop.eup %2716 }
0x1e88   :  { %1681 = vrot.lane.b32.xlu0 %v2717_v32, %s2750_s3 }
0x1e89   :  { %v2719_v34 = vpop.eup %2718 }
0x1e8a   :  { %v1675_v35 = vadd.f32 1.0, %v2719_v34  ;;  %v2002_v34 = vld [vmem:[%s3309_s7 + $0x10] sm:$0xff] }
0x1e8c   :  { %2720 = vrcp.f32 %v1675_v35  ;;  %v2001_v35 = vld [vmem:[%s3309_s7 + $0x8] sm:$0xff] }
0x1e99   :  { %v2721_v36 = vpop.eup %2720 }
0x1e9a   :  { %v1679_v39 = vmul.f32 %v2721_v36, %v1588_v18 }
0x1efa   :  { %v1682_v37 = vpop.permute.xlu0 %1681 }
0x1efb   :  { %v1684_v38 = vmul.f32 %v2721_v36, %v1682_v37 }
0x1efd   :  { %1686 = vrot.lane.b32.xlu1 %v1684_v38, %s2751_s23  ;;  %v2102_v38 = vld [vmem:[%s3310_s9 + $0x78] sm:$0xff] }
0x1f6f   :  { %v1687_v40 = vpop.permute.xlu1 %1686 }
0x1f70   :  { %v1689_v30 = vadd.f32 %v1687_v40, %v1679_v39  ;;  %v2101_v39 = vld [vmem:[%s3310_s9 + $0x70] sm:$0xff]  ;;  %v2100_v40 = vld [vmem:[%s3310_s9 + $0x68] sm:$0xff] }
0x1f72   :  { %2722 = vtanh.f32 %v1689_v30 }
0x1f7f   :  { %v2723_v44 = vpop.eup %2722 }
0x1f80   :  { %1692 = vrot.lane.b32.xlu0 %v2723_v44, %s2750_s3  ;;  %v2098_v44 = vld [vmem:[%s3310_s9 + $0x58] sm:$0xff] }
0x1ff2   :  { %v1693_v45 = vpop.permute.xlu0 %1692 }
0x1ff3   :  { %v1695_v46 = vmul.f32 %v2721_v36, %v1693_v45  ;;  %v2000_v36 = vld [vmem:[%s3309_s7] sm:$0xff] }
0x1ff5   :  { %1698 = vrot.lane.b32.xlu1 %v1695_v46, %s2751_s23 }
0x2067   :  { %v1699_v47 = vpop.permute.xlu1 %1698 }
0x2068   :  { %2546 = vmatmul.mubr.msk.f32.vlgmr.msra.gmra.mxu1 %vm197_vm2, %v1699_v47  ;;  %v2097_v47 = vld [vmem:[%s3310_s9 + $0x50] sm:$0xff] }
0x2069   :  { %2560 = vmatpush3.msra.mxu1 %v3033_v19  ;;  %2567 = vmatprep.mubr.msk.f32.mxu1 %vm2749_vm1, %v2748_v3  ;;  %v1175_v19 = vadd.f32 %v3133_v48, %v3089_v53 }
0x206a   :  { %2561 = vmatprep.subr.mxu1 %v2748_v3 }
0x206b   :  { %2562 = vmatpush3.msra.mxu1 %v3039_v41 }
0x206c   :  { %2563 = vmatprep.subr.mxu1 %v2748_v3 }
0x206d   :  { %2564 = vmatpush3.msra.mxu1 %v3046_v42 }
0x206e   :  { %2565 = vmatprep.subr.mxu1 %v2748_v3 }
0x206f   :  { %2566 = vmatpush3.msra.mxu1 %v3053_v43 }
0x2070   :  { %2581 = vmatprep.subr.mxu1 %v2748_v3 }
0x2128   :  { %v1768_v49 = vpop.f32.mrf.mxu1 }
0x2129   :  { %v1772_v52 = vadd.f32 %v1768_v49, %v1175_v19  ;;  %v2096_v49 = vld [vmem:[%s3310_s9 + $0x48] sm:$0xff] }
0x212a   :  { %v2547_v54 = vpop.f32.mrf.mxu1 }
0x212b   :  { %2724 = vtanh.f32 %v1772_v52  ;;  %v2229_v41 = vmul.f32 -1.442695, %v1772_v52  ;;  %v2095_v52 = vld [vmem:[%s3310_s9 + $0x40] sm:$0xff]  ;;  %v2094_v54 = vld [vmem:[%s3310_s9 + $0x38] sm:$0xff] }
0x212d   :  { %2726 = vpow2.f32 %v2229_v41  ;;  %v2092_v41 = vld [vmem:[%s3310_s9 + $0x28] sm:$0xff] }
0x2138   :  { %v2725_v55 = vpop.eup %2724 }
0x2139   :  { %1782 = vrot.lane.b32.xlu0 %v2725_v55, %s2750_s3  ;;  %v2093_v55 = vld [vmem:[%s3310_s9 + $0x30] sm:$0xff] }
0x213a   :  { %v2727_v56 = vpop.eup %2726 }
0x213b   :  { %v1776_v42 = vadd.f32 1.0, %v2727_v56  ;;  %v2091_v56 = vld [vmem:[%s3310_s9 + $0x20] sm:$0xff] }
0x213d   :  { %2728 = vrcp.f32 %v1776_v42  ;;  %v2090_v42 = vld [vmem:[%s3310_s9 + $0x18] sm:$0xff] }
0x214a   :  { %v2729_v25 = vpop.eup %2728 }
0x214b   :  { %v1780_v58 = vmul.f32 %v2729_v25, %v1689_v30  ;;  %v2099_v30 = vld [vmem:[%s3310_s9 + $0x60] sm:$0xff] }
0x21ab   :  { %v1783_v57 = vpop.permute.xlu0 %1782 }
0x21ac   :  { %v1785_v43 = vmul.f32 %v2729_v25, %v1783_v57  ;;  %v2089_v57 = vld [vmem:[%s3310_s9 + $0x10] sm:$0xff] }
0x21ae   :  { %1787 = vrot.lane.b32.xlu1 %v1785_v43, %s2751_s23  ;;  %v2088_v43 = vld [vmem:[%s3310_s9 + $0x8] sm:$0xff] }
0x2220   :  { %v1788_v59 = vpop.permute.xlu1 %1787 }
0x2221   :  { %v1790_v48 = vadd.f32 %v1788_v59, %v1780_v58  ;;  %v2087_v58 = vld [vmem:[%s3310_s9] sm:$0xff] }
0x2222   :  { %v2234_v59 = vld [vmem:[%s3311_s8] ss:$0 sm:$0xff] }
0x2223   :  { %2730 = vtanh.f32 %v1790_v48 }
0x2230   :  { %v2731_v27 = vpop.eup %2730 }
0x2231   :  { %1793 = vrot.lane.b32.xlu0 %v2731_v27, %s2750_s3 }
0x22a3   :  { %v1794_v60 = vpop.permute.xlu0 %1793 }
0x22a4   :  { %v1796_v4 = vmul.f32 %v2729_v25, %v1794_v60 }
0x22a6   :  { %1799 = vrot.lane.b32.xlu1 %v1796_v4, %s2751_s23 }
0x2318   :  { %v1800_v61 = vpop.permute.xlu1 %1799 }
0x2319   :  { %2557 = vmatmul.mubr.msk.f32.vlgmr.msra.gmra.mxu0 %vm197_vm2, %v1800_v61  ;;  %v2236_v61 = vld [vmem:[%s3312_s10] ss:$0 sm:$0xff] }
0x231a   :  { %2578 = vmatprep.mubr.msk.f32.mxu0 %vm2749_vm1, %v2748_v3  ;;  %2571 = vmatpush3.msra.mxu0 %v2003_v50 }
0x231b   :  { %2572 = vmatprep.subr.mxu0 %v2748_v3 }
0x231c   :  { %2573 = vmatpush3.msra.mxu0 %v2002_v34 }
0x231d   :  { %2574 = vmatprep.subr.mxu0 %v2748_v3 }
0x231e   :  { %2575 = vmatpush3.msra.mxu0 %v2001_v35 }
0x231f   :  { %2576 = vmatprep.subr.mxu0 %v2748_v3 }
0x2320   :  { %2577 = vmatpush3.msra.mxu0 %v2000_v36 }
0x23d9   :  { %v1869_v63 = vpop.f32.mrf.mxu0 }
0x23da   :  { %v1873_v6 = vadd.f32 %v1869_v63, %v1180_v62 }
0x23db   :  { %v2558_v0 = vpop.f32.mrf.mxu0 }
0x23dc   :  { %2732 = vtanh.f32 %v1873_v6  ;;  %v2231_v1 = vmul.f32 -1.442695, %v1873_v6 }
0x23de   :  { %2734 = vpow2.f32 %v2231_v1 }
0x23e9   :  { %v2733_v9 = vpop.eup %2732 }
0x23ea   :  { %1883 = vrot.lane.b32.xlu0 %v2733_v9, %s2750_s3 }
0x23eb   :  { %v2735_v2 = vpop.eup %2734 }
0x23ec   :  { %v1877_v10 = vadd.f32 1.0, %v2735_v2 }
0x23ee   :  { %2736 = vrcp.f32 %v1877_v10 }
0x23fb   :  { %v2737_v5 = vpop.eup %2736 }
0x23fc   :  { %v1881_v8 = vmul.f32 %v2737_v5, %v1790_v48 }
0x245c   :  { %v1884_v7 = vpop.permute.xlu0 %1883 }
0x245d   :  { %v1886_v23 = vmul.f32 %v2737_v5, %v1884_v7 }
0x245f   :  { %1888 = vrot.lane.b32.xlu1 %v1886_v23, %s2751_s23 }
0x24d1   :  { %v1889_v11 = vpop.permute.xlu1 %1888 }
0x24d2   :  { %v1891_v51 = vadd.f32 %v1889_v11, %v1881_v8 }
0x24d4   :  { %2738 = vtanh.f32 %v1891_v51 }
0x24e1   :  { %v2739_v12 = vpop.eup %2738 }
0x24e2   :  { %1894 = vrot.lane.b32.xlu0 %v2739_v12, %s2750_s3 }
0x2554   :  { %v1895_v13 = vpop.permute.xlu0 %1894 }
0x2555   :  { %v1897_v14 = vmul.f32 %v2737_v5, %v1895_v13 }
0x2557   :  { %1900 = vrot.lane.b32.xlu1 %v1897_v14, %s2751_s23 }
0x25c9   :  { %v1901_v15 = vpop.permute.xlu1 %1900 }
0x25ca   :  { %2568 = vmatmul.mubr.msk.f32.vlgmr.msra.gmra.mxu1 %vm197_vm2, %v1901_v15 }
0x25cb   :  { %2613 = vmatprep.mubr.msk.f32.mxu1 %vm2749_vm1, %v2748_v3  ;;  %2582 = vmatpush3.msra.mxu1 %v2102_v38 }
0x25cc   :  { %2583 = vmatprep.subr.mxu1 %v2748_v3 }
0x25cd   :  { %2584 = vmatpush3.msra.mxu1 %v2101_v39 }
0x25ce   :  { %2585 = vmatprep.subr.mxu1 %v2748_v3 }
0x25cf   :  { %2586 = vmatpush3.msra.mxu1 %v2100_v40 }
0x25d0   :  { %2587 = vmatprep.subr.mxu1 %v2748_v3 }
0x25d1   :  { %2588 = vmatpush3.msra.mxu1 %v2099_v30 }
0x25d2   :  { %2589 = vmatprep.subr.mxu1 %v2748_v3 }
0x25d3   :  { %2590 = vmatpush3.msra.mxu1 %v2098_v44 }
0x25d4   :  { %2591 = vmatprep.subr.mxu1 %v2748_v3 }
0x25d5   :  { %2592 = vmatpush3.msra.mxu1 %v2097_v47 }
0x25d6   :  { %2593 = vmatprep.subr.mxu1 %v2748_v3 }
0x25d7   :  { %2594 = vmatpush3.msra.mxu1 %v2096_v49 }
0x25d8   :  { %2595 = vmatprep.subr.mxu1 %v2748_v3 }
0x25d9   :  { %2596 = vmatpush3.msra.mxu1 %v2095_v52 }
0x25da   :  { %2597 = vmatprep.subr.mxu1 %v2748_v3 }
0x25db   :  { %2598 = vmatpush3.msra.mxu1 %v2094_v54 }
0x25dc   :  { %2599 = vmatprep.subr.mxu1 %v2748_v3 }
0x25dd   :  { %2600 = vmatpush3.msra.mxu1 %v2093_v55 }
0x25de   :  { %2601 = vmatprep.subr.mxu1 %v2748_v3 }
0x25df   :  { %2602 = vmatpush3.msra.mxu1 %v2092_v41 }
0x25e0   :  { %2603 = vmatprep.subr.mxu1 %v2748_v3 }
0x25e1   :  { %2604 = vmatpush3.msra.mxu1 %v2091_v56 }
0x25e2   :  { %2605 = vmatprep.subr.mxu1 %v2748_v3 }
0x25e3   :  { %2606 = vmatpush3.msra.mxu1 %v2090_v42 }
0x25e4   :  { %2607 = vmatprep.subr.mxu1 %v2748_v3 }
0x25e5   :  { %2608 = vmatpush3.msra.mxu1 %v2089_v57 }
0x25e6   :  { %2609 = vmatprep.subr.mxu1 %v2748_v3 }
0x25e7   :  { %2610 = vmatpush3.msra.mxu1 %v2088_v43 }
0x25e8   :  { %2611 = vmatprep.subr.mxu1 %v2748_v3 }
0x25e9   :  { %2612 = vmatpush3.msra.mxu1 %v2087_v58 }
0x268a   :  { %v1970_v17 = vpop.f32.mrf.mxu1 }
0x268b   :  { %v1974_v18 = vadd.f32 %v1970_v17, %v1185_v16 }
0x268c   :  { %v2569_v20 = vpop.f32.mrf.mxu1 }
0x268d   :  { %2740 = vtanh.f32 %v1974_v18  ;;  %v2233_v22 = vmul.f32 -1.442695, %v1974_v18 }
0x268f   :  { %2742 = vpow2.f32 %v2233_v22 }
0x269a   :  { %v2741_v21 = vpop.eup %2740 }
0x269b   :  { %1984 = vrot.lane.b32.xlu0 %v2741_v21, %s2750_s3 }
0x269c   :  { %v2743_v24 = vpop.eup %2742 }
0x269d   :  { %v1978_v26 = vadd.f32 1.0, %v2743_v24 }
0x269f   :  { %2744 = vrcp.f32 %v1978_v26 }
0x26ac   :  { %v2745_v28 = vpop.eup %2744 }
0x26ad   :  { %v1982_v32 = vmul.f32 %v2745_v28, %v1891_v51 }
0x270d   :  { %v1985_v29 = vpop.permute.xlu0 %1984 }
0x270e   :  { %v1987_v31 = vmul.f32 %v2745_v28, %v1985_v29 }
0x2710   :  { %1989 = vrot.lane.b32.xlu1 %v1987_v31, %s2751_s23 }
0x2782   :  { %v1990_v33 = vpop.permute.xlu1 %1989 }
0x2783   :  { %v1992_v53 = vadd.f32 %v1990_v33, %v1982_v32 }
0x2785   :  { %2746 = vtanh.f32 %v1992_v53 }
0x2792   :  { %v2747_v37 = vpop.eup %2746 }
0x2793   :  { %1995 = vrot.lane.b32.xlu0 %v2747_v37, %s2750_s3 }
0x2805   :  { %v1996_v45 = vpop.permute.xlu0 %1995 }
0x2806   :  { %v1998_v46 = vmul.f32 %v2745_v28, %v1996_v45 }
0x2808   :  { %v1999_v19 = vmax.f32 %v1998_v46, 0.0 }
0x280a   :  { %2012 = vrot.lane.b32.xlu1 %v1999_v19, %s2751_s23 }
0x287c   :  { %v2013_v25 = vpop.permute.xlu1 %2012 }
0x287d   :  { %2579 = vmatmul.mubr.msk.f32.vlgmr.msra.gmra.mxu0 %vm197_vm2, %v2013_v25 }
0x293d   :  { %v2082_v48 = vpop.f32.mrf.mxu0 }
0x293e   :  { %v2083_v27 = vadd.f32 %v2234_v59, %v2082_v48 }
0x293f   :  { %v2580_v60 = vpop.f32.mrf.mxu0 }
0x2940   :  { %v2086_v4 = vmax.f32 %v2083_v27, 0.0 }
0x2942   :  { %2614 = vmatmul.mubr.f32.vlgmr.msra.gmra.mxu1 %v2086_v4 }
0x2a02   :  { %v2176_v62 = vpop.f32.mrf.mxu1 }
0x2a03   :  { %v2177_v3 = vadd.f32 %v2236_v61, %v2176_v62 }
0x2a04   :  { %v2615_v63 = vpop.f32.mrf.mxu1 }
0x2a05   :  { %2181 = vst.msk [vmem:[%s3313_s11] sm:$0xff] %vm2180_vm3, %v2177_v3 }

</bundles_post_ra>
